<compile_context>
chip_gen: v6e
topology: v6e:2x2x1
jax: 0.10.0
libtpu: 0.0.40
codegen_flags: <defaults>
</compile_context>

<pallas_src>
import functools

import numpy as np
import jax
import jax.numpy as jnp
from jax import lax
from jax.experimental import pallas as pl
from jax.experimental.pallas import tpu as pltpu

# Static geometry implied by the PyTorch module (enc fc1 = 64*6*6 -> 28x28x1 input).
H_IN = 28
C1_OUT, C2_OUT = 32, 64
H1, H2 = 13, 6                    # conv1 / conv2 output spatial extent (k=3, s=2, valid)
S1, S2 = H1 * H1, H2 * H2         # 169, 36
KTAPS = 9                         # 3x3 kernel taps
DEC_OUT = 7 * 7 * 32              # 1568


# ----------------------------------------------------------------------------
# One fused kernel: processes a single batch element per grid step.
# ----------------------------------------------------------------------------
def _vae_kernel(p1_ref, w1_ref, b1_ref, sel_ref, w2_ref, b2_ref,
                w3_ref, w4_ref, b4_ref, o_ref, *, latent_dim):
    # ---- Encoder conv1: im2col patches (169, 9) @ (9, 32) + bias, ReLU ----
    h1 = jnp.dot(p1_ref[0], w1_ref[...], preferred_element_type=jnp.float32)
    h1 = jnp.maximum(h1 + b1_ref[...], 0.0)                       # (169, 32)

    # ---- Encoder conv2: in-kernel im2col via 9 constant 0/1 selection matmuls ----
    acc = jnp.zeros((S2, C2_OUT), jnp.float32)
    for t in range(KTAPS):
        tap = jnp.dot(sel_ref[t], h1, preferred_element_type=jnp.float32)      # (36, 32)
        acc = acc + jnp.dot(tap, w2_ref[t], preferred_element_type=jnp.float32)  # (36, 64)
    h2 = jnp.maximum(acc + b2_ref[...], 0.0)                      # (36, 64)

    # ---- Encoder FC (mean chunk) + Decoder FC, fused ----
    # z_pre[l] = sum_{s,c} h2[s,c] * w3[l,s,c]   (enc-fc bias pre-folded into b4_ref)
    # TODO(synk): as in the PyTorch source, only split #0 (the mean) feeds the decoder;
    # logsig is never used and reparameterization (broken torch.normal()) is absent.
    dec = b4_ref[...]                                             # (1, 1568)
    for l in range(latent_dim):
        z_l = jnp.sum(h2 * w3_ref[l])                             # scalar reduction
        dec = dec + z_l * w4_ref[l:l + 1, :]
    o_ref[0] = jnp.maximum(dec, 0.0).astype(o_ref.dtype)          # ReLU + store (lane-dense)


# ----------------------------------------------------------------------------
# Constant conv2 im2col selection: sel[t, s, k] = 1 iff conv2 output pixel s reads
# conv1 output pixel k for kernel tap t = i*3+j  (stride 2, valid).
# ----------------------------------------------------------------------------
def _conv2_tap_selection():
    sel = np.zeros((KTAPS, S2, S1), np.float32)
    for i in range(3):
        for j in range(3):
            t = i * 3 + j
            for ho in range(H2):
                for wo in range(H2):
                    sel[t, ho * H2 + wo, (2 * ho + i) * H1 + (2 * wo + j)] = 1.0
    return jnp.asarray(sel)


# ----------------------------------------------------------------------------
# Torch-shaped parameter init (deterministic, torch-default-like uniform bounds).
# ----------------------------------------------------------------------------
def init_params(latent_dim, key):
    ks = jax.random.split(key, 8)

    def u(k, shape, fan_in):
        bound = 1.0 / float(np.sqrt(fan_in))
        return jax.random.uniform(k, shape, jnp.float32, -bound, bound)

    return {
        "conv1_w": u(ks[0], (C1_OUT, 1, 3, 3), 1 * 9),
        "conv1_b": u(ks[1], (C1_OUT,), 1 * 9),
        "conv2_w": u(ks[2], (C2_OUT, C1_OUT, 3, 3), C1_OUT * 9),
        "conv2_b": u(ks[3], (C2_OUT,), C1_OUT * 9),
        "enc_fc_w": u(ks[4], (2 * latent_dim, C2_OUT * S2), C2_OUT * S2),
        "enc_fc_b": u(ks[5], (2 * latent_dim,), C2_OUT * S2),
        "dec_fc_w": u(ks[6], (DEC_OUT, latent_dim), latent_dim),
        "dec_fc_b": u(ks[7], (DEC_OUT,), latent_dim),
    }


# ----------------------------------------------------------------------------
# One-time layout prep (outside jit): kernel-friendly, pre-transposed weights.
# ----------------------------------------------------------------------------
def prepare_params(params, latent_dim):
    # conv weights: (Cout, Cin, KH, KW) -> tap-major (KH*KW, Cin, Cout)
    w1 = jnp.transpose(params["conv1_w"], (2, 3, 1, 0)).reshape(KTAPS, C1_OUT)
    b1 = params["conv1_b"].reshape(1, C1_OUT)
    w2 = jnp.transpose(params["conv2_w"], (2, 3, 1, 0)).reshape(KTAPS, C1_OUT, C2_OUT)
    b2 = params["conv2_b"].reshape(1, C2_OUT)
    # torch Flatten of (N, 64, 6, 6) gives fc1 input index c*36 + s  ->  w3[o, s, c]
    w3 = params["enc_fc_w"].reshape(2 * latent_dim, C2_OUT, S2).transpose(0, 2, 1)
    w4 = params["dec_fc_w"].T                                     # (latent, 1568)
    # Fold enc-fc bias (mean chunk) into the decoder bias:
    # relu((z_pre + b3) @ W4 + b4) == relu(z_pre @ W4 + (b3 @ W4 + b4)).
    b4 = (params["dec_fc_b"] + params["enc_fc_b"][:latent_dim] @ w4).reshape(1, DEC_OUT)
    return dict(w1=w1, b1=b1, w2=w2, b2=b2, w3=w3, w4=w4, b4=b4,
                sel=_conv2_tap_selection())


# ----------------------------------------------------------------------------
# Fused VAE forward: one pallas_call, grid over the batch.
# ----------------------------------------------------------------------------
@functools.partial(jax.jit, static_argnames=("latent_dim",))
def vae_forward(prep, x_nchw, *, latent_dim):
    n = x_nchw.shape[0]
    # conv1 im2col as ONE XLA op producing a tiny (N, 169, 9) patch tensor.
    patches = lax.conv_general_dilated_patches(
        x_nchw, filter_shape=(3, 3), window_strides=(2, 2), padding="VALID",
        dimension_numbers=("NCHW", "OIHW", "NCHW"))               # (N, 9, 13, 13)
    p1 = jnp.transpose(patches, (0, 2, 3, 1)).reshape(n, S1, KTAPS)

    kernel = functools.partial(_vae_kernel, latent_dim=latent_dim)
    out = pl.pallas_call(
        kernel,
        out_shape=jax.ShapeDtypeStruct((n, 1, DEC_OUT), jnp.float32),
        grid=(n,),
        in_specs=[
            pl.BlockSpec((1, S1, KTAPS), lambda b: (b, 0, 0)),              # patches
            pl.BlockSpec((KTAPS, C1_OUT), lambda b: (0, 0)),                # w1
            pl.BlockSpec((1, C1_OUT), lambda b: (0, 0)),                    # b1
            pl.BlockSpec((KTAPS, S2, S1), lambda b: (0, 0, 0)),             # conv2 taps
            pl.BlockSpec((KTAPS, C1_OUT, C2_OUT), lambda b: (0, 0, 0)),     # w2
            pl.BlockSpec((1, C2_OUT), lambda b: (0, 0)),                    # b2
            pl.BlockSpec((2 * latent_dim, S2, C2_OUT), lambda b: (0, 0, 0)),  # w3 (enc fc)
            pl.BlockSpec((latent_dim, DEC_OUT), lambda b: (0, 0)),          # w4 (dec fc)
            pl.BlockSpec((1, DEC_OUT), lambda b: (0, 0)),                   # b4 (folded)
        ],
        out_specs=pl.BlockSpec((1, 1, DEC_OUT), lambda b: (b, 0, 0)),
        compiler_params=pltpu.CompilerParams(dimension_semantics=("parallel",)),
    )(p1, prep["w1"], prep["b1"], prep["sel"], prep["w2"], prep["b2"],
      prep["w3"], prep["w4"], prep["b4"])
    return out.reshape(n, 7, 7, 32)       # nn.Unflatten(1, (7, 7, 32))


# ----------------------------------------------------------------------------
# Pure-JAX reference (PyTorch semantics) for an in-script correctness check.
# ----------------------------------------------------------------------------
def vae_forward_reference(params, x_nchw, latent_dim):
    hp = lax.Precision.HIGHEST
    y = lax.conv_general_dilated(x_nchw, params["conv1_w"], (2, 2), "VALID",
                                 dimension_numbers=("NCHW", "OIHW", "NCHW"), precision=hp)
    y = jax.nn.relu(y + params["conv1_b"].reshape(1, C1_OUT, 1, 1))
    y = lax.conv_general_dilated(y, params["conv2_w"], (2, 2), "VALID",
                                 dimension_numbers=("NCHW", "OIHW", "NCHW"), precision=hp)
    y = jax.nn.relu(y + params["conv2_b"].reshape(1, C2_OUT, 1, 1))
    flat = y.reshape(y.shape[0], -1)                              # torch Flatten (C,H,W)
    enc = jnp.dot(flat, params["enc_fc_w"].T, precision=hp) + params["enc_fc_b"]
    z = enc[:, :2]                                                # torch.split(.., 2)[0]
    dec = jax.nn.relu(jnp.dot(z, params["dec_fc_w"].T, precision=hp) + params["dec_fc_b"])
    return dec.reshape(y.shape[0], 7, 7, 32)


if __name__ == "__main__":
    latent_dim = 2   # split(.., 2) chunks only match the decoder width when latent_dim == 2
    assert latent_dim == 2

    key = jax.random.PRNGKey(0)
    pkey, xkey = jax.random.split(key)
    params = init_params(latent_dim, pkey)
    prep = prepare_params(params, latent_dim)

    # Encoder fc1 (64*6*6 inputs) implies 28x28 single-channel images (MNIST-like).
    x = jax.random.normal(xkey, (2, 1, H_IN, H_IN), jnp.float32)

    out = vae_forward(prep, x, latent_dim=latent_dim)
    jax.block_until_ready(out)
    assert out.shape == (2, 7, 7, 32), out.shape
    assert out.dtype == jnp.float32

    ref = vae_forward_reference(params, x, latent_dim)
    err = float(jnp.max(jnp.abs(out - ref)))
    assert err < 1e-2, f"max abs error vs reference: {err}"

    print("KERNEL_OK")
</pallas_src>

<mosaic_0001>
module attributes {stable_mosaic.version = 11 : i64} {
  func.func @_vae_kernel(%arg0: i32, %arg1: memref<1x169x9xf32, #tpu.memory_space<vmem>>, %arg2: memref<9x32xf32, #tpu.memory_space<vmem>>, %arg3: memref<1x32xf32, #tpu.memory_space<vmem>>, %arg4: memref<9x36x169xf32, #tpu.memory_space<vmem>>, %arg5: memref<9x32x64xf32, #tpu.memory_space<vmem>>, %arg6: memref<1x64xf32, #tpu.memory_space<vmem>>, %arg7: memref<4x36x64xf32, #tpu.memory_space<vmem>>, %arg8: memref<2x1568xf32, #tpu.memory_space<vmem>>, %arg9: memref<1x1568xf32, #tpu.memory_space<vmem>>, %arg10: memref<1x1x1568xf32, #tpu.memory_space<vmem>>) attributes {dimension_semantics = [#tpu.dimension_semantics<parallel>], iteration_bounds = array<i64: 2>, scalar_prefetch = 0 : i64, scratch_operands = 0 : i64, tpu.core_type = #tpu.core_type<tc>, window_params = [{transform_indices = @transform_0, window_bounds = array<i64: 1, 169, 9>}, {pipeline_mode = #tpu.pipeline_mode<synchronous>, transform_indices = @transform_1, window_bounds = array<i64: 9, 32>}, {pipeline_mode = #tpu.pipeline_mode<synchronous>, transform_indices = @transform_2, window_bounds = array<i64: 1, 32>}, {pipeline_mode = #tpu.pipeline_mode<synchronous>, transform_indices = @transform_3, window_bounds = array<i64: 9, 36, 169>}, {pipeline_mode = #tpu.pipeline_mode<synchronous>, transform_indices = @transform_4, window_bounds = array<i64: 9, 32, 64>}, {pipeline_mode = #tpu.pipeline_mode<synchronous>, transform_indices = @transform_5, window_bounds = array<i64: 1, 64>}, {pipeline_mode = #tpu.pipeline_mode<synchronous>, transform_indices = @transform_6, window_bounds = array<i64: 4, 36, 64>}, {pipeline_mode = #tpu.pipeline_mode<synchronous>, transform_indices = @transform_7, window_bounds = array<i64: 2, 1568>}, {pipeline_mode = #tpu.pipeline_mode<synchronous>, transform_indices = @transform_8, window_bounds = array<i64: 1, 1568>}, {transform_indices = @transform_9, window_bounds = array<i64: 1, 1, 1568>}]} {
    %c0 = arith.constant 0 : index
    %c0_0 = arith.constant 0 : index
    %c0_1 = arith.constant 0 : index
    %0 = vector.load %arg1[%c0, %c0_0, %c0_1] : memref<1x169x9xf32, #tpu.memory_space<vmem>>, vector<1x169x9xf32>
    %1 = vector.shape_cast %0 : vector<1x169x9xf32> to vector<169x9xf32>
    %c0_2 = arith.constant 0 : index
    %c0_3 = arith.constant 0 : index
    %2 = vector.load %arg2[%c0_2, %c0_3] : memref<9x32xf32, #tpu.memory_space<vmem>>, vector<9x32xf32>
    %cst = arith.constant dense<0.000000e+00> : vector<169x32xf32>
    %3 = tpu.matmul %1, %2, %cst {dimension_numbers = #tpu.dot_dimension_numbers<[1], [0], [0], [1], [0, 0, 1, 1], [], []>} : vector<169x9xf32>, vector<9x32xf32>, vector<169x32xf32> -> vector<169x32xf32>
    %c0_4 = arith.constant 0 : index
    %c0_5 = arith.constant 0 : index
    %4 = vector.load %arg3[%c0_4, %c0_5] : memref<1x32xf32, #tpu.memory_space<vmem>>, vector<1x32xf32>
    %5 = vector.broadcast %4 : vector<1x32xf32> to vector<169x32xf32>
    %6 = arith.addf %3, %5 : vector<169x32xf32>
    %cst_6 = arith.constant 0.000000e+00 : f32
    %7 = vector.broadcast %cst_6 : f32 to vector<169x32xf32>
    %8 = arith.maximumf %6, %7 : vector<169x32xf32>
    %cst_7 = arith.constant 0.000000e+00 : f32
    %9 = vector.broadcast %cst_7 : f32 to vector<36x64xf32>
    %c0_8 = arith.constant 0 : index
    %c0_9 = arith.constant 0 : index
    %c0_10 = arith.constant 0 : index
    %10 = vector.load %arg4[%c0_8, %c0_9, %c0_10] : memref<9x36x169xf32, #tpu.memory_space<vmem>>, vector<1x36x169xf32>
    %11 = vector.shape_cast %10 : vector<1x36x169xf32> to vector<36x169xf32>
    %cst_11 = arith.constant dense<0.000000e+00> : vector<36x32xf32>
    %12 = tpu.matmul %11, %8, %cst_11 {dimension_numbers = #tpu.dot_dimension_numbers<[1], [0], [0], [1], [0, 0, 1, 1], [], []>} : vector<36x169xf32>, vector<169x32xf32>, vector<36x32xf32> -> vector<36x32xf32>
    %c0_12 = arith.constant 0 : index
    %c0_13 = arith.constant 0 : index
    %c0_14 = arith.constant 0 : index
    %13 = vector.load %arg5[%c0_12, %c0_13, %c0_14] : memref<9x32x64xf32, #tpu.memory_space<vmem>>, vector<1x32x64xf32>
    %14 = vector.shape_cast %13 : vector<1x32x64xf32> to vector<32x64xf32>
    %cst_15 = arith.constant dense<0.000000e+00> : vector<36x64xf32>
    %15 = tpu.matmul %12, %14, %cst_15 {dimension_numbers = #tpu.dot_dimension_numbers<[1], [0], [0], [1], [0, 0, 1, 1], [], []>} : vector<36x32xf32>, vector<32x64xf32>, vector<36x64xf32> -> vector<36x64xf32>
    %16 = arith.addf %9, %15 : vector<36x64xf32>
    %c1 = arith.constant 1 : index
    %c0_16 = arith.constant 0 : index
    %c0_17 = arith.constant 0 : index
    %17 = vector.load %arg4[%c1, %c0_16, %c0_17] : memref<9x36x169xf32, #tpu.memory_space<vmem>>, vector<1x36x169xf32>
    %18 = vector.shape_cast %17 : vector<1x36x169xf32> to vector<36x169xf32>
    %cst_18 = arith.constant dense<0.000000e+00> : vector<36x32xf32>
    %19 = tpu.matmul %18, %8, %cst_18 {dimension_numbers = #tpu.dot_dimension_numbers<[1], [0], [0], [1], [0, 0, 1, 1], [], []>} : vector<36x169xf32>, vector<169x32xf32>, vector<36x32xf32> -> vector<36x32xf32>
    %c1_19 = arith.constant 1 : index
    %c0_20 = arith.constant 0 : index
    %c0_21 = arith.constant 0 : index
    %20 = vector.load %arg5[%c1_19, %c0_20, %c0_21] : memref<9x32x64xf32, #tpu.memory_space<vmem>>, vector<1x32x64xf32>
    %21 = vector.shape_cast %20 : vector<1x32x64xf32> to vector<32x64xf32>
    %cst_22 = arith.constant dense<0.000000e+00> : vector<36x64xf32>
    %22 = tpu.matmul %19, %21, %cst_22 {dimension_numbers = #tpu.dot_dimension_numbers<[1], [0], [0], [1], [0, 0, 1, 1], [], []>} : vector<36x32xf32>, vector<32x64xf32>, vector<36x64xf32> -> vector<36x64xf32>
    %23 = arith.addf %16, %22 : vector<36x64xf32>
    %c2 = arith.constant 2 : index
    %c0_23 = arith.constant 0 : index
    %c0_24 = arith.constant 0 : index
    %24 = vector.load %arg4[%c2, %c0_23, %c0_24] : memref<9x36x169xf32, #tpu.memory_space<vmem>>, vector<1x36x169xf32>
    %25 = vector.shape_cast %24 : vector<1x36x169xf32> to vector<36x169xf32>
    %cst_25 = arith.constant dense<0.000000e+00> : vector<36x32xf32>
    %26 = tpu.matmul %25, %8, %cst_25 {dimension_numbers = #tpu.dot_dimension_numbers<[1], [0], [0], [1], [0, 0, 1, 1], [], []>} : vector<36x169xf32>, vector<169x32xf32>, vector<36x32xf32> -> vector<36x32xf32>
    %c2_26 = arith.constant 2 : index
    %c0_27 = arith.constant 0 : index
    %c0_28 = arith.constant 0 : index
    %27 = vector.load %arg5[%c2_26, %c0_27, %c0_28] : memref<9x32x64xf32, #tpu.memory_space<vmem>>, vector<1x32x64xf32>
    %28 = vector.shape_cast %27 : vector<1x32x64xf32> to vector<32x64xf32>
    %cst_29 = arith.constant dense<0.000000e+00> : vector<36x64xf32>
    %29 = tpu.matmul %26, %28, %cst_29 {dimension_numbers = #tpu.dot_dimension_numbers<[1], [0], [0], [1], [0, 0, 1, 1], [], []>} : vector<36x32xf32>, vector<32x64xf32>, vector<36x64xf32> -> vector<36x64xf32>
    %30 = arith.addf %23, %29 : vector<36x64xf32>
    %c3 = arith.constant 3 : index
    %c0_30 = arith.constant 0 : index
    %c0_31 = arith.constant 0 : index
    %31 = vector.load %arg4[%c3, %c0_30, %c0_31] : memref<9x36x169xf32, #tpu.memory_space<vmem>>, vector<1x36x169xf32>
    %32 = vector.shape_cast %31 : vector<1x36x169xf32> to vector<36x169xf32>
    %cst_32 = arith.constant dense<0.000000e+00> : vector<36x32xf32>
    %33 = tpu.matmul %32, %8, %cst_32 {dimension_numbers = #tpu.dot_dimension_numbers<[1], [0], [0], [1], [0, 0, 1, 1], [], []>} : vector<36x169xf32>, vector<169x32xf32>, vector<36x32xf32> -> vector<36x32xf32>
    %c3_33 = arith.constant 3 : index
    %c0_34 = arith.constant 0 : index
    %c0_35 = arith.constant 0 : index
    %34 = vector.load %arg5[%c3_33, %c0_34, %c0_35] : memref<9x32x64xf32, #tpu.memory_space<vmem>>, vector<1x32x64xf32>
    %35 = vector.shape_cast %34 : vector<1x32x64xf32> to vector<32x64xf32>
    %cst_36 = arith.constant dense<0.000000e+00> : vector<36x64xf32>
    %36 = tpu.matmul %33, %35, %cst_36 {dimension_numbers = #tpu.dot_dimension_numbers<[1], [0], [0], [1], [0, 0, 1, 1], [], []>} : vector<36x32xf32>, vector<32x64xf32>, vector<36x64xf32> -> vector<36x64xf32>
    %37 = arith.addf %30, %36 : vector<36x64xf32>
    %c4 = arith.constant 4 : index
    %c0_37 = arith.constant 0 : index
    %c0_38 = arith.constant 0 : index
    %38 = vector.load %arg4[%c4, %c0_37, %c0_38] : memref<9x36x169xf32, #tpu.memory_space<vmem>>, vector<1x36x169xf32>
    %39 = vector.shape_cast %38 : vector<1x36x169xf32> to vector<36x169xf32>
    %cst_39 = arith.constant dense<0.000000e+00> : vector<36x32xf32>
    %40 = tpu.matmul %39, %8, %cst_39 {dimension_numbers = #tpu.dot_dimension_numbers<[1], [0], [0], [1], [0, 0, 1, 1], [], []>} : vector<36x169xf32>, vector<169x32xf32>, vector<36x32xf32> -> vector<36x32xf32>
    %c4_40 = arith.constant 4 : index
    %c0_41 = arith.constant 0 : index
    %c0_42 = arith.constant 0 : index
    %41 = vector.load %arg5[%c4_40, %c0_41, %c0_42] : memref<9x32x64xf32, #tpu.memory_space<vmem>>, vector<1x32x64xf32>
    %42 = vector.shape_cast %41 : vector<1x32x64xf32> to vector<32x64xf32>
    %cst_43 = arith.constant dense<0.000000e+00> : vector<36x64xf32>
    %43 = tpu.matmul %40, %42, %cst_43 {dimension_numbers = #tpu.dot_dimension_numbers<[1], [0], [0], [1], [0, 0, 1, 1], [], []>} : vector<36x32xf32>, vector<32x64xf32>, vector<36x64xf32> -> vector<36x64xf32>
    %44 = arith.addf %37, %43 : vector<36x64xf32>
    %c5 = arith.constant 5 : index
    %c0_44 = arith.constant 0 : index
    %c0_45 = arith.constant 0 : index
    %45 = vector.load %arg4[%c5, %c0_44, %c0_45] : memref<9x36x169xf32, #tpu.memory_space<vmem>>, vector<1x36x169xf32>
    %46 = vector.shape_cast %45 : vector<1x36x169xf32> to vector<36x169xf32>
    %cst_46 = arith.constant dense<0.000000e+00> : vector<36x32xf32>
    %47 = tpu.matmul %46, %8, %cst_46 {dimension_numbers = #tpu.dot_dimension_numbers<[1], [0], [0], [1], [0, 0, 1, 1], [], []>} : vector<36x169xf32>, vector<169x32xf32>, vector<36x32xf32> -> vector<36x32xf32>
    %c5_47 = arith.constant 5 : index
    %c0_48 = arith.constant 0 : index
    %c0_49 = arith.constant 0 : index
    %48 = vector.load %arg5[%c5_47, %c0_48, %c0_49] : memref<9x32x64xf32, #tpu.memory_space<vmem>>, vector<1x32x64xf32>
    %49 = vector.shape_cast %48 : vector<1x32x64xf32> to vector<32x64xf32>
    %cst_50 = arith.constant dense<0.000000e+00> : vector<36x64xf32>
    %50 = tpu.matmul %47, %49, %cst_50 {dimension_numbers = #tpu.dot_dimension_numbers<[1], [0], [0], [1], [0, 0, 1, 1], [], []>} : vector<36x32xf32>, vector<32x64xf32>, vector<36x64xf32> -> vector<36x64xf32>
    %51 = arith.addf %44, %50 : vector<36x64xf32>
    %c6 = arith.constant 6 : index
    %c0_51 = arith.constant 0 : index
    %c0_52 = arith.constant 0 : index
    %52 = vector.load %arg4[%c6, %c0_51, %c0_52] : memref<9x36x169xf32, #tpu.memory_space<vmem>>, vector<1x36x169xf32>
    %53 = vector.shape_cast %52 : vector<1x36x169xf32> to vector<36x169xf32>
    %cst_53 = arith.constant dense<0.000000e+00> : vector<36x32xf32>
    %54 = tpu.matmul %53, %8, %cst_53 {dimension_numbers = #tpu.dot_dimension_numbers<[1], [0], [0], [1], [0, 0, 1, 1], [], []>} : vector<36x169xf32>, vector<169x32xf32>, vector<36x32xf32> -> vector<36x32xf32>
    %c6_54 = arith.constant 6 : index
    %c0_55 = arith.constant 0 : index
    %c0_56 = arith.constant 0 : index
    %55 = vector.load %arg5[%c6_54, %c0_55, %c0_56] : memref<9x32x64xf32, #tpu.memory_space<vmem>>, vector<1x32x64xf32>
    %56 = vector.shape_cast %55 : vector<1x32x64xf32> to vector<32x64xf32>
    %cst_57 = arith.constant dense<0.000000e+00> : vector<36x64xf32>
    %57 = tpu.matmul %54, %56, %cst_57 {dimension_numbers = #tpu.dot_dimension_numbers<[1], [0], [0], [1], [0, 0, 1, 1], [], []>} : vector<36x32xf32>, vector<32x64xf32>, vector<36x64xf32> -> vector<36x64xf32>
    %58 = arith.addf %51, %57 : vector<36x64xf32>
    %c7 = arith.constant 7 : index
    %c0_58 = arith.constant 0 : index
    %c0_59 = arith.constant 0 : index
    %59 = vector.load %arg4[%c7, %c0_58, %c0_59] : memref<9x36x169xf32, #tpu.memory_space<vmem>>, vector<1x36x169xf32>
    %60 = vector.shape_cast %59 : vector<1x36x169xf32> to vector<36x169xf32>
    %cst_60 = arith.constant dense<0.000000e+00> : vector<36x32xf32>
    %61 = tpu.matmul %60, %8, %cst_60 {dimension_numbers = #tpu.dot_dimension_numbers<[1], [0], [0], [1], [0, 0, 1, 1], [], []>} : vector<36x169xf32>, vector<169x32xf32>, vector<36x32xf32> -> vector<36x32xf32>
    %c7_61 = arith.constant 7 : index
    %c0_62 = arith.constant 0 : index
    %c0_63 = arith.constant 0 : index
    %62 = vector.load %arg5[%c7_61, %c0_62, %c0_63] : memref<9x32x64xf32, #tpu.memory_space<vmem>>, vector<1x32x64xf32>
    %63 = vector.shape_cast %62 : vector<1x32x64xf32> to vector<32x64xf32>
    %cst_64 = arith.constant dense<0.000000e+00> : vector<36x64xf32>
    %64 = tpu.matmul %61, %63, %cst_64 {dimension_numbers = #tpu.dot_dimension_numbers<[1], [0], [0], [1], [0, 0, 1, 1], [], []>} : vector<36x32xf32>, vector<32x64xf32>, vector<36x64xf32> -> vector<36x64xf32>
    %65 = arith.addf %58, %64 : vector<36x64xf32>
    %c8 = arith.constant 8 : index
    %c0_65 = arith.constant 0 : index
    %c0_66 = arith.constant 0 : index
    %66 = vector.load %arg4[%c8, %c0_65, %c0_66] : memref<9x36x169xf32, #tpu.memory_space<vmem>>, vector<1x36x169xf32>
    %67 = vector.shape_cast %66 : vector<1x36x169xf32> to vector<36x169xf32>
    %cst_67 = arith.constant dense<0.000000e+00> : vector<36x32xf32>
    %68 = tpu.matmul %67, %8, %cst_67 {dimension_numbers = #tpu.dot_dimension_numbers<[1], [0], [0], [1], [0, 0, 1, 1], [], []>} : vector<36x169xf32>, vector<169x32xf32>, vector<36x32xf32> -> vector<36x32xf32>
    %c8_68 = arith.constant 8 : index
    %c0_69 = arith.constant 0 : index
    %c0_70 = arith.constant 0 : index
    %69 = vector.load %arg5[%c8_68, %c0_69, %c0_70] : memref<9x32x64xf32, #tpu.memory_space<vmem>>, vector<1x32x64xf32>
    %70 = vector.shape_cast %69 : vector<1x32x64xf32> to vector<32x64xf32>
    %cst_71 = arith.constant dense<0.000000e+00> : vector<36x64xf32>
    %71 = tpu.matmul %68, %70, %cst_71 {dimension_numbers = #tpu.dot_dimension_numbers<[1], [0], [0], [1], [0, 0, 1, 1], [], []>} : vector<36x32xf32>, vector<32x64xf32>, vector<36x64xf32> -> vector<36x64xf32>
    %72 = arith.addf %65, %71 : vector<36x64xf32>
    %c0_72 = arith.constant 0 : index
    %c0_73 = arith.constant 0 : index
    %73 = vector.load %arg6[%c0_72, %c0_73] : memref<1x64xf32, #tpu.memory_space<vmem>>, vector<1x64xf32>
    %74 = vector.broadcast %73 : vector<1x64xf32> to vector<36x64xf32>
    %75 = arith.addf %72, %74 : vector<36x64xf32>
    %cst_74 = arith.constant 0.000000e+00 : f32
    %76 = vector.broadcast %cst_74 : f32 to vector<36x64xf32>
    %77 = arith.maximumf %75, %76 : vector<36x64xf32>
    %c0_75 = arith.constant 0 : index
    %c0_76 = arith.constant 0 : index
    %78 = vector.load %arg9[%c0_75, %c0_76] : memref<1x1568xf32, #tpu.memory_space<vmem>>, vector<1x1568xf32>
    %c0_77 = arith.constant 0 : index
    %c0_78 = arith.constant 0 : index
    %c0_79 = arith.constant 0 : index
    %79 = vector.load %arg7[%c0_77, %c0_78, %c0_79] : memref<4x36x64xf32, #tpu.memory_space<vmem>>, vector<1x36x64xf32>
    %80 = vector.shape_cast %79 : vector<1x36x64xf32> to vector<36x64xf32>
    %81 = arith.mulf %77, %80 : vector<36x64xf32>
    %82 = vector.shape_cast %81 : vector<36x64xf32> to vector<1x36x64xf32>
    %cst_80 = arith.constant dense<0.000000e+00> : vector<1xf32>
    %83 = vector.multi_reduction <add>, %82, %cst_80 [1, 2] : vector<1x36x64xf32> to vector<1xf32>
    %84 = vector.shape_cast %83 : vector<1xf32> to vector<1x1x1xf32>
    %85 = vector.extract %84[0, 0, 0] : f32 from vector<1x1x1xf32>
    %c0_81 = arith.constant 0 : index
    %c0_82 = arith.constant 0 : index
    %86 = vector.load %arg8[%c0_81, %c0_82] : memref<2x1568xf32, #tpu.memory_space<vmem>>, vector<1x1568xf32>
    %87 = vector.broadcast %85 : f32 to vector<1x1568xf32>
    %88 = arith.mulf %87, %86 : vector<1x1568xf32>
    %89 = arith.addf %78, %88 : vector<1x1568xf32>
    %c1_83 = arith.constant 1 : index
    %c0_84 = arith.constant 0 : index
    %c0_85 = arith.constant 0 : index
    %90 = vector.load %arg7[%c1_83, %c0_84, %c0_85] : memref<4x36x64xf32, #tpu.memory_space<vmem>>, vector<1x36x64xf32>
    %91 = vector.shape_cast %90 : vector<1x36x64xf32> to vector<36x64xf32>
    %92 = arith.mulf %77, %91 : vector<36x64xf32>
    %93 = vector.shape_cast %92 : vector<36x64xf32> to vector<1x36x64xf32>
    %cst_86 = arith.constant dense<0.000000e+00> : vector<1xf32>
    %94 = vector.multi_reduction <add>, %93, %cst_86 [1, 2] : vector<1x36x64xf32> to vector<1xf32>
    %95 = vector.shape_cast %94 : vector<1xf32> to vector<1x1x1xf32>
    %96 = vector.extract %95[0, 0, 0] : f32 from vector<1x1x1xf32>
    %c1_87 = arith.constant 1 : index
    %c0_88 = arith.constant 0 : index
    %97 = vector.load %arg8[%c1_87, %c0_88] : memref<2x1568xf32, #tpu.memory_space<vmem>>, vector<1x1568xf32>
    %98 = vector.broadcast %96 : f32 to vector<1x1568xf32>
    %99 = arith.mulf %98, %97 : vector<1x1568xf32>
    %100 = arith.addf %89, %99 : vector<1x1568xf32>
    %cst_89 = arith.constant 0.000000e+00 : f32
    %101 = vector.broadcast %cst_89 : f32 to vector<1x1568xf32>
    %102 = arith.maximumf %100, %101 : vector<1x1568xf32>
    %c0_90 = arith.constant 0 : index
    %c0_91 = arith.constant 0 : index
    %c0_92 = arith.constant 0 : index
    %103 = vector.load %arg10[%c0_90, %c0_91, %c0_92] : memref<1x1x1568xf32, #tpu.memory_space<vmem>>, vector<1x1x1568xf32>
    %104 = vector.shape_cast %103 : vector<1x1x1568xf32> to vector<1x1568xf32>
    %105 = vector.shape_cast %102 : vector<1x1568xf32> to vector<1x1x1568xf32>
    tpu.vector_store %arg10[%c0_90, %c0_91, %c0_92], %105 {strides = array<i32>} : memref<1x1x1568xf32, #tpu.memory_space<vmem>>, vector<1x1x1568xf32>,
    return
  }
  func.func @transform_0(%arg0: i32) -> (i32, i32, i32) {
    %c0_i32 = arith.constant 0 : i32
    %c0_i32_0 = arith.constant 0 : i32
    %c0_i32_1 = arith.constant 0 : i32
    return %arg0, %c0_i32, %c0_i32_0 : i32, i32, i32
  }
  func.func @transform_1(%arg0: i32) -> (i32, i32) {
    %c0_i32 = arith.constant 0 : i32
    %c0_i32_0 = arith.constant 0 : i32
    %c0_i32_1 = arith.constant 0 : i32
    return %c0_i32, %c0_i32_0 : i32, i32
  }
  func.func @transform_2(%arg0: i32) -> (i32, i32) {
    %c0_i32 = arith.constant 0 : i32
    %c0_i32_0 = arith.constant 0 : i32
    %c0_i32_1 = arith.constant 0 : i32
    return %c0_i32, %c0_i32_0 : i32, i32
  }
  func.func @transform_3(%arg0: i32) -> (i32, i32, i32) {
    %c0_i32 = arith.constant 0 : i32
    %c0_i32_0 = arith.constant 0 : i32
    %c0_i32_1 = arith.constant 0 : i32
    %c0_i32_2 = arith.constant 0 : i32
    return %c0_i32, %c0_i32_0, %c0_i32_1 : i32, i32, i32
  }
  func.func @transform_4(%arg0: i32) -> (i32, i32, i32) {
    %c0_i32 = arith.constant 0 : i32
    %c0_i32_0 = arith.constant 0 : i32
    %c0_i32_1 = arith.constant 0 : i32
    %c0_i32_2 = arith.constant 0 : i32
    return %c0_i32, %c0_i32_0, %c0_i32_1 : i32, i32, i32
  }
  func.func @transform_5(%arg0: i32) -> (i32, i32) {
    %c0_i32 = arith.constant 0 : i32
    %c0_i32_0 = arith.constant 0 : i32
    %c0_i32_1 = arith.constant 0 : i32
    return %c0_i32, %c0_i32_0 : i32, i32
  }
  func.func @transform_6(%arg0: i32) -> (i32, i32, i32) {
    %c0_i32 = arith.constant 0 : i32
    %c0_i32_0 = arith.constant 0 : i32
    %c0_i32_1 = arith.constant 0 : i32
    %c0_i32_2 = arith.constant 0 : i32
    return %c0_i32, %c0_i32_0, %c0_i32_1 : i32, i32, i32
  }
  func.func @transform_7(%arg0: i32) -> (i32, i32) {
    %c0_i32 = arith.constant 0 : i32
    %c0_i32_0 = arith.constant 0 : i32
    %c0_i32_1 = arith.constant 0 : i32
    return %c0_i32, %c0_i32_0 : i32, i32
  }
  func.func @transform_8(%arg0: i32) -> (i32, i32) {
    %c0_i32 = arith.constant 0 : i32
    %c0_i32_0 = arith.constant 0 : i32
    %c0_i32_1 = arith.constant 0 : i32
    return %c0_i32, %c0_i32_0 : i32, i32
  }
  func.func @transform_9(%arg0: i32) -> (i32, i32, i32) {
    %c0_i32 = arith.constant 0 : i32
    %c0_i32_0 = arith.constant 0 : i32
    %c0_i32_1 = arith.constant 0 : i32
    return %arg0, %c0_i32, %c0_i32_0 : i32, i32, i32
  }
}

</mosaic_0001>

<bundles_post_ra>
// kernel: vae_forward.1
= control target key start
LH: loop header
LB: loop body
LE: loop exit
PB: predicated region body
PF: predicated region fallthrough
CT: control target
= control target key end

     0   :  { %s3535_s30 = smov 0   ;;  %s4853_s0 = inlined_call_operand.vmem [shape: f32[2,169,9], index: 0, kind: input, shape index: {}]   ;;  %s4854_s1 = inlined_call_operand.vmem [shape: f32[9,32], index: 1, kind: input, shape index: {}]   ;;  %s4855_s2 = inlined_call_operand.vmem [shape: f32[1,32], index: 2, kind: input, shape index: {}]   ;;  %s4856_s3 = inlined_call_operand.vmem [shape: f32[9,36,169], index: 3, kind: input, shape index: {}]   ;;  %s4857_s4 = inlined_call_operand.vmem [shape: f32[9,32,64], index: 4, kind: input, shape index: {}]   ;;  %s4858_s5 = inlined_call_operand.vmem [shape: f32[1,64], index: 5, kind: input, shape index: {}]   ;;  %s4859_s6 = inlined_call_operand.vmem [shape: f32[4,36,64], index: 6, kind: input, shape index: {}]   ;;  %s4860_s7 = inlined_call_operand.vmem [shape: f32[2,1568], index: 7, kind: input, shape index: {}]   ;;  %s4861_s8 = inlined_call_operand.vmem [shape: f32[1,1568], index: 8, kind: input, shape index: {}]   ;;  %s4862_s9 = inlined_call_operand.vmem [shape: f32[2,1,1568], index: 9, kind: output, shape index: {}]  }
   0x1 LB: > { %s2858_s10 = sadd.s32 4294967295, %s3481_s30   ;;  %p2862_p0 = scmp.ge.s32.totalorder %s3481_s30, 1  ;;  %s3481_s30 = sphi %s3535_s30, %s19_s30  }
   0x2   : > { %p287_p1 = scmp.lt.s32.totalorder %s3481_s30, 3 }
   0x4   : > { %p288_p2 = pnand %p2862_p0, %p287_p1 }
   0x5   : > { %p322_p3 = scmp.lt.s32.totalorder (!%p288_p2), %s2858_s10, 1 }
   0x6   : > { %291 = sbr.rel (%p288_p2) target bundleno = 2569 (0xa09), region = 56 }
   0xb   : > { %v354_v0 = vld [vmem:[%s4854_s1 + $0x8] sm:$0x1]  ;;  %vm429_vm0 = vcmask 1040384   ;;  %v353_v1 = vld [vmem:[%s4854_s1] sm:$0xff]  ;;  %s4864_s10 = smov (!%p322_p3, %s2858_s10), 1  ;;  %vm362_vm1 = vcmask 72704  }
   0xc   : > { %3215 = vmatprep.subr.msk.mxu0 %vm429_vm0, %v354_v0  ;;  %s3459_s15 = smul.u32 176, %s4864_s10  ;;  %v3483_v24 = vmov 0.0   ;;  %vm640_vm2 = vcmask 334848   ;;  %v2895_v25 = vld [vmem:[%s4856_s3 + $0x58] sm:$0xff]  ;;  %v631_v26 = vld [vmem:[%s4856_s3 + $0x8] sm:$0xff]  ;;  %vm3484_vm3 = vmmov 0  }
   0xd   : > { %3216 = vmatpush3.msk.msra.mxu0 %vm429_vm0, %v354_v0  ;;  %659 = vmatprep.subr.mxu1 %v3483_v24  ;;  %v3626_v41 = vld [vmem:[%s4855_s2] ss:$0 sm:$0xff]  ;;  %vm874_vm4 = vcmask 261120   ;;  %vm2731_vm5 = vcmask 523264   ;;  %vm2739_vm6 = vcmask 519168   ;;  %s3460_s24 = smul.u32 13, %s4864_s10 }
   0xe   : > { %3217 = vmatprep.subr.mxu0 %v353_v1  ;;  %s3557_s18 = scalar_lea.vmem %s4853_s0, %s3459_s15  ;;  %2889 = vmatprep.mubr.msk.f32.mxu1 %vm640_vm2, %v631_v26 }
   0xf   : > { %3218 = vmatpush3.msra.mxu0 %v353_v1  ;;  %v331_v2 = vld [vmem:[%s3557_s18] sm:$0xff]  ;;  %v332_v3 = vld [vmem:[%s3557_s18 + $0x8] sm:$0xff]  ;;  %v333_v4 = vld [vmem:[%s3557_s18 + $0x10] sm:$0xff]  ;;  %s330_s27 = scalar_lea.vmem %s4862_s9, %s3460_s24 }
  0x10   : > { %3219 = vmatprep.mubr.msk.f32.mxu0 %vm362_vm1, %v331_v2  ;;  %v334_v5 = vld [vmem:[%s3557_s18 + $0x18] sm:$0xff]  ;;  %v335_v6 = vld [vmem:[%s3557_s18 + $0x20] sm:$0xff]  ;;  %v336_v7 = vld [vmem:[%s3557_s18 + $0x28] sm:$0xff]  ;;  %779 = vmatprep.subr.mxu0 %v3483_v24 }
  0x11   : > { %3220 = vmatmul.mubr.msk.f32.vlgmr.msra.gmra.mxu0 %vm362_vm1, %v332_v3  ;;  %v337_v8 = vld [vmem:[%s3557_s18 + $0x30] sm:$0xff]  ;;  %v338_v9 = vld [vmem:[%s3557_s18 + $0x38] sm:$0xff]  ;;  %v339_v10 = vld [vmem:[%s3557_s18 + $0x40] sm:$0xff] }
  0x12   : > { %3222 = vmatprep.mubr.msk.f32.mxu0 %vm362_vm1, %v333_v4  ;;  %v340_v11 = vld [vmem:[%s3557_s18 + $0x48] sm:$0xff]  ;;  %v341_v12 = vld [vmem:[%s3557_s18 + $0x50] sm:$0xff]  ;;  %v342_v13 = vld [vmem:[%s3557_s18 + $0x58] sm:$0xff] }
  0x13   : > { %v343_v14 = vld [vmem:[%s3557_s18 + $0x60] sm:$0xff]  ;;  %v344_v15 = vld [vmem:[%s3557_s18 + $0x68] sm:$0xff]  ;;  %v345_v16 = vld [vmem:[%s3557_s18 + $0x70] sm:$0xff] }
  0x14   : > { %v346_v17 = vld [vmem:[%s3557_s18 + $0x78] sm:$0xff]  ;;  %v347_v18 = vld [vmem:[%s3557_s18 + $0x80] sm:$0xff]  ;;  %v348_v19 = vld [vmem:[%s3557_s18 + $0x88] sm:$0xff] }
  0x15   : > { %3223 = vmatmul.mubr.msk.f32.gmra.mxu0 %vm362_vm1, %v334_v5  ;;  %v349_v20 = vld [vmem:[%s3557_s18 + $0x90] sm:$0xff]  ;;  %v350_v21 = vld [vmem:[%s3557_s18 + $0x98] sm:$0xff]  ;;  %v351_v22 = vld [vmem:[%s3557_s18 + $0xa0] sm:$0xff] }
  0x16   : > { %3225 = vmatprep.mubr.msk.f32.mxu0 %vm362_vm1, %v335_v6  ;;  %v352_v23 = vld [vmem:[%s3557_s18 + $0xa8] sm:$0x1] }
  0x19   : > { %3226 = vmatmul.mubr.msk.f32.gmra.mxu0 %vm362_vm1, %v336_v7 }
  0x1a   : > { %3228 = vmatprep.mubr.msk.f32.mxu0 %vm362_vm1, %v337_v8 }
  0x1d   : > { %3229 = vmatmul.mubr.msk.f32.gmra.mxu0 %vm362_vm1, %v338_v9 }
  0x1e   : > { %3231 = vmatprep.mubr.msk.f32.mxu0 %vm362_vm1, %v339_v10 }
  0x21   : > { %3232 = vmatmul.mubr.msk.f32.gmra.mxu0 %vm362_vm1, %v340_v11 }
  0x22   : > { %3234 = vmatprep.mubr.msk.f32.mxu0 %vm362_vm1, %v341_v12 }
  0x25   : > { %3235 = vmatmul.mubr.msk.f32.gmra.mxu0 %vm362_vm1, %v342_v13 }
  0x26   : > { %3237 = vmatprep.mubr.msk.f32.mxu0 %vm362_vm1, %v343_v14 }
  0x29   : > { %3238 = vmatmul.mubr.msk.f32.gmra.mxu0 %vm362_vm1, %v344_v15 }
  0x2a   : > { %3240 = vmatprep.mubr.msk.f32.mxu0 %vm362_vm1, %v345_v16 }
  0x2d   : > { %3241 = vmatmul.mubr.msk.f32.gmra.mxu0 %vm362_vm1, %v346_v17 }
  0x2e   : > { %3243 = vmatprep.mubr.msk.f32.mxu0 %vm362_vm1, %v347_v18 }
  0x31   : > { %3244 = vmatmul.mubr.msk.f32.gmra.mxu0 %vm362_vm1, %v348_v19 }
  0x32   : > { %3246 = vmatprep.mubr.msk.f32.mxu0 %vm362_vm1, %v349_v20 }
  0x35   : > { %3247 = vmatmul.mubr.msk.f32.gmra.mxu0 %vm362_vm1, %v350_v21 }
  0x36   : > { %3249 = vmatprep.mubr.msk.f32.mxu0 %vm362_vm1, %v351_v22 }
  0x39   : > { %3250 = vmatmul.mubr.msk.f32.gmra.mxu0 %vm362_vm1, %v352_v23 }
  0x3a   : > { %2905 = vmatprep.mubr.msk.f32.mxu0 %vm640_vm2, %v2895_v25 }
  0xd1   : > { %v3613_v27 = vpop.f32.mrf.mxu0 }
  0xd2   : > { %v505_v11 = vadd.f32 %v3613_v27, %v3626_v41 }
  0xd3   : > { %v3615_v28 = vpop.f32.mrf.mxu0 }
  0xd4   : > { %v500_v13 = vadd.f32 %v3626_v41, %v3615_v28  ;;  %v3734_v17 = vmax.f32 %v505_v11, 0.0 }
  0xd5   : > { %v3617_v29 = vpop.f32.mrf.mxu0 }
  0xd6   : > { %v515_v6 = vadd.f32 %v3617_v29, %v3626_v41  ;;  %v3740_v18 = vmax.f32 %v500_v13, 0.0 }
  0xd7   : > { %v3619_v30 = vpop.f32.mrf.mxu0 }
  0xd8   : > { %v510_v8 = vadd.f32 %v3626_v41, %v3619_v30  ;;  %v3719_v12 = vmax.f32 %v515_v6, 0.0 }
  0xd9   : > { %v3227_v31 = vpop.f32.mrf.mxu0 }
  0xda   : > { %v525_v1 = vadd.f32 %v3227_v31, %v3626_v41  ;;  %v3727_v14 = vmax.f32 %v510_v8, 0.0  ;;  %v2894_v31 = vld [vmem:[%s4856_s3 + $0x50] sm:$0xff] }
  0xdb   : > { %v3621_v32 = vpop.f32.mrf.mxu0 }
  0xdc   : > { %v520_v3 = vadd.f32 %v3626_v41, %v3621_v32  ;;  %v3703_v7 = vmax.f32 %v525_v1, 0.0  ;;  %v630_v32 = vld [vmem:[%s4856_s3] sm:$0xff] }
  0xdd   : > { %v3230_v33 = vpop.f32.mrf.mxu0 }
  0xde   : > { %v535_v60 = vadd.f32 %v3230_v33, %v3626_v41  ;;  %v3711_v9 = vmax.f32 %v520_v3, 0.0  ;;  %v2897_v33 = vld [vmem:[%s4856_s3 + $0x68] sm:$0xff] }
  0xdf   : > { %v529_v34 = vpop.f32.mrf.mxu0 }
  0xe0   : > { %v530_v62 = vadd.f32 %v3626_v41, %v529_v34  ;;  %v3687_v2 = vmax.f32 %v535_v60, 0.0  ;;  %v633_v34 = vld [vmem:[%s4856_s3 + $0x18] sm:$0xff]  ;;  %v2902_v60 = vld [vmem:[%s4856_s3 + $0x90] sm:$0xf] }
  0xe1   : > { %v3233_v35 = vpop.f32.mrf.mxu0 }
  0xe2   : > { %v545_v55 = vadd.f32 %v3233_v35, %v3626_v41  ;;  %v3695_v4 = vmax.f32 %v530_v62, 0.0  ;;  %v2913_v35 = vld [vmem:[%s4857_s4 + $0x38] sm:$0xff]  ;;  %v638_v62 = vld [vmem:[%s4856_s3 + $0x40] sm:$0xf] }
  0xe3   : > { %v539_v36 = vpop.f32.mrf.mxu0 }
  0xe4   : > { %v540_v57 = vadd.f32 %v3626_v41, %v539_v36  ;;  %v3673_v61 = vmax.f32 %v545_v55, 0.0  ;;  %v752_v36 = vld [vmem:[%s4857_s4 + $0x18] sm:$0xff] }
  0xe5   : > { %v3236_v37 = vpop.f32.mrf.mxu0  ;;  %v2903_v55 = vld [vmem:[%s4856_s3 + $0x98] sm:$0xf] }
  0xe6   : > { %v555_v50 = vadd.f32 %v3236_v37, %v3626_v41  ;;  %v3680_v63 = vmax.f32 %v540_v57, 0.0  ;;  %v2896_v37 = vld [vmem:[%s4856_s3 + $0x60] sm:$0xff]  ;;  %v639_v57 = vld [vmem:[%s4856_s3 + $0x48] sm:$0xf] }
  0xe7   : > { %v549_v38 = vpop.f32.mrf.mxu0 }
  0xe8   : > { %v550_v52 = vadd.f32 %v3626_v41, %v549_v38  ;;  %v3657_v56 = vmax.f32 %v555_v50, 0.0  ;;  %v632_v38 = vld [vmem:[%s4856_s3 + $0x10] sm:$0xff]  ;;  %v750_v50 = vld [vmem:[%s4857_s4 + $0x8] sm:$0xff] }
  0xe9   : > { %v3239_v39 = vpop.f32.mrf.mxu0 }
  0xea   : > { %v565_v45 = vadd.f32 %v3239_v39, %v3626_v41  ;;  %v3664_v58 = vmax.f32 %v550_v52, 0.0  ;;  %v2899_v39 = vld [vmem:[%s4856_s3 + $0x78] sm:$0xff]  ;;  %v2900_v52 = vld [vmem:[%s4856_s3 + $0x80] sm:$0xff] }
  0xeb   : > { %v559_v40 = vpop.f32.mrf.mxu0 }
  0xec   : > { %v560_v48 = vadd.f32 %v3626_v41, %v559_v40  ;;  %v3641_v51 = vmax.f32 %v565_v45, 0.0  ;;  %v635_v40 = vld [vmem:[%s4856_s3 + $0x28] sm:$0xff] }
  0xed   : > { %v3242_v42 = vpop.f32.mrf.mxu0  ;;  %v2901_v45 = vld [vmem:[%s4856_s3 + $0x88] sm:$0xff] }
  0xee   : > { %v575_v43 = vadd.f32 %v3242_v42, %v3626_v41  ;;  %v3648_v53 = vmax.f32 %v560_v48, 0.0  ;;  %v751_v42 = vld [vmem:[%s4857_s4 + $0x10] sm:$0xff]  ;;  %v2911_v48 = vld [vmem:[%s4857_s4 + $0x28] sm:$0xff] }
  0xef   : > { %v569_v44 = vpop.f32.mrf.mxu0 }
  0xf0   : > { %v3630_v46 = vmax.f32 %v575_v43, 0.0  ;;  %v570_v47 = vadd.f32 %v3626_v41, %v569_v44  ;;  %v2898_v43 = vld [vmem:[%s4856_s3 + $0x70] sm:$0xff]  ;;  %v634_v44 = vld [vmem:[%s4856_s3 + $0x20] sm:$0xff] }
  0xf1   : > { %v3654_v54 = vpop.f32.mrf.mxu0 }
  0xf2   : > { %v3634_v49 = vmax.f32 %v570_v47, 0.0  ;;  %660 = vmatpush1.msra.mxu1 %v3630_v46  ;;  %780 = vmatpush1.msra.mxu0 %v3630_v46  ;;  %v585_v25 = vadd.f32 %v3654_v54, %v3626_v41  ;;  %v637_v47 = vld [vmem:[%s4856_s3 + $0x38] sm:$0xff]  ;;  %v636_v54 = vld [vmem:[%s4856_s3 + $0x30] sm:$0xff] }
  0xf3   : > { %661 = vmatprep.subr.mxu1 %v3483_v24  ;;  %781 = vmatprep.subr.mxu0 %v3483_v24  ;;  %v3670_v59 = vpop.f32.mrf.mxu0 }
  0xf4   : > { %662 = vmatpush1.msra.mxu1 %v3634_v49  ;;  %782 = vmatpush1.msra.mxu0 %v3634_v49  ;;  %v580_v27 = vadd.f32 %v3626_v41, %v3670_v59  ;;  %v3779_v29 = vmax.f32 %v585_v25, 0.0  ;;  %v2910_v59 = vld [vmem:[%s4857_s4 + $0x20] sm:$0xff] }
  0xf5   : > { %663 = vmatprep.subr.mxu1 %v3483_v24  ;;  %783 = vmatprep.subr.mxu0 %v3483_v24  ;;  %v3248_v0 = vpop.f32.mrf.mxu0 }
  0xf6   : > { %664 = vmatpush1.msra.mxu1 %v3641_v51  ;;  %784 = vmatpush1.msra.mxu0 %v3641_v51  ;;  %v595_v21 = vadd.f32 %v3248_v0, %v3626_v41  ;;  %v3785_v30 = vmax.f32 %v580_v27, 0.0  ;;  %v749_v0 = vld [vmem:[%s4857_s4] sm:$0xff] }
  0xf7   : > { %665 = vmatprep.subr.mxu1 %v3483_v24  ;;  %785 = vmatprep.subr.mxu0 %v3483_v24  ;;  %v589_v5 = vpop.f32.mrf.mxu0 }
  0xf8   : > { %666 = vmatpush1.msra.mxu1 %v3648_v53  ;;  %786 = vmatpush1.msra.mxu0 %v3648_v53  ;;  %v590_v22 = vadd.f32 %v3626_v41, %v589_v5  ;;  %v3765_v26 = vmax.f32 %v595_v21, 0.0 }
  0xf9   : > { %667 = vmatprep.subr.mxu1 %v3483_v24  ;;  %787 = vmatprep.subr.mxu0 %v3483_v24  ;;  %v3251_v10 = vpop.f32.mrf.mxu0 }
  0xfa   : > { %668 = vmatpush1.msra.mxu1 %v3657_v56  ;;  %788 = vmatpush1.msra.mxu0 %v3657_v56  ;;  %v605_v15 = vadd.f32 %v3251_v10, %v3626_v41  ;;  %v3773_v28 = vmax.f32 %v590_v22, 0.0 }
  0xfb   : > { %669 = vmatprep.subr.mxu1 %v3483_v24  ;;  %789 = vmatprep.subr.mxu0 %v3483_v24  ;;  %v599_v16 = vpop.f32.mrf.mxu0 }
  0xfc   : > { %670 = vmatpush1.msra.mxu1 %v3664_v58  ;;  %790 = vmatpush1.msra.mxu0 %v3664_v58  ;;  %v3742_v19 = vmax.f32 %v605_v15, 0.0  ;;  %v600_v20 = vadd.f32 %v3626_v41, %v599_v16  ;;  %v2912_v41 = vld [vmem:[%s4857_s4 + $0x30] sm:$0xff] }
  0xfd   : > { %671 = vmatprep.subr.mxu1 %v3483_v24  ;;  %791 = vmatprep.subr.mxu0 %v3483_v24 }
  0xfe   : > { %672 = vmatpush1.msra.mxu1 %v3673_v61  ;;  %792 = vmatpush1.msra.mxu0 %v3673_v61  ;;  %v3755_v23 = vmax.f32 %v600_v20, 0.0 }
  0xff   : > { %673 = vmatprep.subr.mxu1 %v3483_v24  ;;  %793 = vmatprep.subr.mxu0 %v3483_v24 }
 0x100   : > { %674 = vmatpush1.msra.mxu1 %v3680_v63  ;;  %794 = vmatpush1.msra.mxu0 %v3680_v63 }
 0x101   : > { %675 = vmatprep.subr.mxu1 %v3483_v24  ;;  %795 = vmatprep.subr.mxu0 %v3483_v24 }
 0x102   : > { %676 = vmatpush1.msra.mxu1 %v3687_v2  ;;  %796 = vmatpush1.msra.mxu0 %v3687_v2 }
 0x103   : > { %677 = vmatprep.subr.mxu1 %v3483_v24  ;;  %797 = vmatprep.subr.mxu0 %v3483_v24 }
 0x104   : > { %678 = vmatpush1.msra.mxu1 %v3695_v4  ;;  %798 = vmatpush1.msra.mxu0 %v3695_v4 }
 0x105   : > { %679 = vmatprep.subr.mxu1 %v3483_v24  ;;  %799 = vmatprep.subr.mxu0 %v3483_v24 }
 0x106   : > { %680 = vmatpush1.msra.mxu1 %v3703_v7  ;;  %800 = vmatpush1.msra.mxu0 %v3703_v7 }
 0x107   : > { %681 = vmatprep.subr.mxu1 %v3483_v24  ;;  %801 = vmatprep.subr.mxu0 %v3483_v24 }
 0x108   : > { %682 = vmatpush1.msra.mxu1 %v3711_v9  ;;  %802 = vmatpush1.msra.mxu0 %v3711_v9 }
 0x109   : > { %683 = vmatprep.subr.mxu1 %v3483_v24  ;;  %803 = vmatprep.subr.mxu0 %v3483_v24 }
 0x10a   : > { %684 = vmatpush1.msra.mxu1 %v3719_v12  ;;  %804 = vmatpush1.msra.mxu0 %v3719_v12 }
 0x10b   : > { %685 = vmatprep.subr.mxu1 %v3483_v24  ;;  %805 = vmatprep.subr.mxu0 %v3483_v24 }
 0x10c   : > { %686 = vmatpush1.msra.mxu1 %v3727_v14  ;;  %806 = vmatpush1.msra.mxu0 %v3727_v14 }
 0x10d   : > { %687 = vmatprep.subr.mxu1 %v3483_v24  ;;  %807 = vmatprep.subr.mxu0 %v3483_v24 }
 0x10e   : > { %688 = vmatpush1.msra.mxu1 %v3734_v17  ;;  %808 = vmatpush1.msra.mxu0 %v3734_v17 }
 0x10f   : > { %689 = vmatprep.subr.mxu1 %v3483_v24  ;;  %809 = vmatprep.subr.mxu0 %v3483_v24 }
 0x110   : > { %690 = vmatpush1.msra.mxu1 %v3740_v18  ;;  %810 = vmatpush1.msra.mxu0 %v3740_v18 }
 0x111   : > { %711 = vmatprep.subr.mxu1 %v3483_v24  ;;  %831 = vmatprep.subr.mxu0 %v3483_v24 }
 0x112   : > { %2888 = vmatpush2.msk.msra.mxu1 %vm429_vm0, %v3742_v19  ;;  %2904 = vmatpush2.msk.msra.mxu0 %vm429_vm0, %v3742_v19 }
 0x113   : > { %713 = vmatprep.subr.mxu1 %v3483_v24  ;;  %833 = vmatprep.subr.mxu0 %v3483_v24 }
 0x114   : > { %714 = vmatpush2.msra.mxu1 %v3755_v23  ;;  %834 = vmatpush2.msra.mxu0 %v3755_v23 }
 0x115   : > { %715 = vmatprep.subr.mxu1 %v3483_v24  ;;  %835 = vmatprep.subr.mxu0 %v3483_v24 }
 0x116   : > { %716 = vmatpush2.msra.mxu1 %v3765_v26  ;;  %836 = vmatpush2.msra.mxu0 %v3765_v26 }
 0x117   : > { %717 = vmatprep.subr.mxu1 %v3483_v24  ;;  %837 = vmatprep.subr.mxu0 %v3483_v24 }
 0x118   : > { %718 = vmatpush2.msra.mxu1 %v3773_v28  ;;  %838 = vmatpush2.msra.mxu0 %v3773_v28 }
 0x119   : > { %719 = vmatprep.subr.mxu1 %v3483_v24  ;;  %839 = vmatprep.subr.mxu0 %v3483_v24 }
 0x11a   : > { %720 = vmatpush2.msra.mxu1 %v3779_v29  ;;  %840 = vmatpush2.msra.mxu0 %v3779_v29 }
 0x11b   : > { %721 = vmatprep.subr.mxu1 %v3483_v24  ;;  %841 = vmatprep.subr.mxu0 %v3483_v24 }
 0x11c   : > { %722 = vmatpush2.msra.mxu1 %v3785_v30  ;;  %842 = vmatpush2.msra.mxu0 %v3785_v30 }
 0x11d   : > { %844 = vmatmul.mubr.f32.vlgmr.msra.gmra.mxu0 %v2894_v31  ;;  %724 = vmatmul.mubr.f32.vlgmr.msra.gmra.mxu1 %v630_v32 }
 0x11e   : > { %2906 = vmatprep.mubr.msk.f32.mxu0 %vm640_vm2, %v2897_v33  ;;  %2890 = vmatprep.mubr.msk.f32.mxu1 %vm640_vm2, %v633_v34  ;;  %v2925_v34 = vld [vmem:[%s4856_s3 + $0xa8] sm:$0xff] }
 0x11f   : > { %3252 = vmatprep.subr.mxu1 %v3483_v24  ;;  %3275 = vmatprep.subr.mxu0 %v3483_v24 }
 0x120   : > { %3253 = vmatpush3.msra.mxu1 %v2913_v35  ;;  %3276 = vmatpush3.msra.mxu0 %v752_v36 }
 0x121   : > { %849 = vmatmul.mubr.f32.gmra.mxu0 %v2896_v37  ;;  %729 = vmatmul.mubr.f32.gmra.mxu1 %v632_v38  ;;  %v2924_v37 = vld [vmem:[%s4856_s3 + $0xa0] sm:$0xff]  ;;  %v2927_v38 = vld [vmem:[%s4856_s3 + $0xb8] sm:$0xff] }
 0x122   : > { %2907 = vmatprep.mubr.msk.f32.mxu0 %vm640_vm2, %v2899_v39  ;;  %2891 = vmatprep.mubr.msk.f32.mxu1 %vm640_vm2, %v635_v40  ;;  %v2926_v39 = vld [vmem:[%s4856_s3 + $0xb0] sm:$0xff]  ;;  %v2929_v40 = vld [vmem:[%s4856_s3 + $0xc8] sm:$0xff] }
 0x123   : > { %3254 = vmatprep.subr.mxu1 %v3483_v24  ;;  %3277 = vmatprep.subr.mxu0 %v3483_v24 }
 0x124   : > { %3255 = vmatpush3.msra.mxu1 %v2912_v41  ;;  %3278 = vmatpush3.msra.mxu0 %v751_v42  ;;  %v2928_v41 = vld [vmem:[%s4856_s3 + $0xc0] sm:$0xff]  ;;  %v2931_v42 = vld [vmem:[%s4856_s3 + $0xd8] sm:$0xff] }
 0x125   : > { %854 = vmatmul.mubr.f32.gmra.mxu0 %v2898_v43  ;;  %734 = vmatmul.mubr.f32.gmra.mxu1 %v634_v44  ;;  %v2930_v43 = vld [vmem:[%s4856_s3 + $0xd0] sm:$0xff]  ;;  %v2933_v44 = vld [vmem:[%s4856_s3 + $0xe8] sm:$0xf] }
 0x126   : > { %2908 = vmatprep.mubr.msk.f32.mxu0 %vm640_vm2, %v2901_v45  ;;  %2892 = vmatprep.mubr.msk.f32.mxu1 %vm640_vm2, %v637_v47  ;;  %v2932_v45 = vld [vmem:[%s4856_s3 + $0xe0] sm:$0xf]  ;;  %v2943_v47 = vld [vmem:[%s4857_s4 + $0x58] sm:$0xff] }
 0x127   : > { %3256 = vmatprep.subr.mxu1 %v3483_v24  ;;  %3279 = vmatprep.subr.mxu0 %v3483_v24 }
 0x128   : > { %3257 = vmatpush3.msra.mxu1 %v2911_v48  ;;  %3280 = vmatpush3.msra.mxu0 %v750_v50  ;;  %v2942_v48 = vld [vmem:[%s4857_s4 + $0x50] sm:$0xff]  ;;  %v2941_v50 = vld [vmem:[%s4857_s4 + $0x48] sm:$0xff] }
 0x129   : > { %859 = vmatmul.mubr.f32.gmra.mxu0 %v2900_v52  ;;  %739 = vmatmul.mubr.f32.gmra.mxu1 %v636_v54  ;;  %v2940_v52 = vld [vmem:[%s4857_s4 + $0x40] sm:$0xff] }
 0x12a   : > { %2909 = vmatprep.mubr.msk.f32.mxu0 %vm640_vm2, %v2903_v55  ;;  %2893 = vmatprep.mubr.msk.f32.mxu1 %vm640_vm2, %v639_v57 }
 0x12b   : > { %3258 = vmatprep.subr.mxu1 %v3483_v24  ;;  %3281 = vmatprep.subr.mxu0 %v3483_v24 }
 0x12c   : > { %3259 = vmatpush3.msra.mxu1 %v2910_v59  ;;  %3282 = vmatpush3.msra.mxu0 %v749_v0 }
 0x12d   : > { %864 = vmatmul.mubr.f32.gmra.mxu0 %v2902_v60  ;;  %744 = vmatmul.mubr.f32.gmra.mxu1 %v638_v62 }
 0x12e   : > { %1111 = vmatprep.subr.mxu1 %v3483_v24  ;;  %3260 = vmatprep.mubr.msk.f32.mxu1 %vm3484_vm3, %v3483_v24 }
 0x12f   : > { %3283 = vmatprep.mubr.msk.f32.mxu0 %vm3484_vm3, %v3483_v24  ;;  %3298 = vmatprep.subr.mxu0 %v3483_v24 }
 0x1dd   : > { %v845_v1 = vpop.f32.mrf.mxu0  ;;  %v725_v3 = vpop.f32.mrf.mxu1 }
 0x1de   : > { %3261 = vmatmul.mubr.msk.f32.vlgmr.msra.gmra.mxu1 %vm874_vm4, %v845_v1  ;;  %3284 = vmatmul.mubr.msk.f32.vlgmr.msra.gmra.mxu0 %vm874_vm4, %v725_v3 }
 0x1df   : > { %1112 = vmatpush1.msra.mxu1 %v3630_v46  ;;  %v847_v5 = vpop.f32.mrf.mxu0  ;;  %v727_v6 = vpop.f32.mrf.mxu1  ;;  %3263 = vmatprep.mubr.msk.f32.mxu1 %vm3484_vm3, %v3483_v24 }
 0x1e0   : > { %1113 = vmatprep.subr.mxu1 %v3483_v24  ;;  %3286 = vmatprep.mubr.msk.f32.mxu0 %vm3484_vm3, %v3483_v24 }
 0x1e1   : > { %1114 = vmatpush1.msra.mxu1 %v3634_v49  ;;  %v850_v8 = vpop.f32.mrf.mxu0  ;;  %v730_v10 = vpop.f32.mrf.mxu1  ;;  %3299 = vmatpush3.msra.mxu0 %v2943_v47  ;;  %v2952_v47 = vld [vmem:[%s4856_s3 + $0x108] sm:$0xff] }
 0x1e2   : > { %1115 = vmatprep.subr.mxu1 %v3483_v24  ;;  %3264 = vmatmul.mubr.msk.f32.gmra.mxu1 %vm874_vm4, %v850_v8 }
 0x1e3   : > { %1116 = vmatpush1.msra.mxu1 %v3641_v51  ;;  %v852_v11 = vpop.f32.mrf.mxu0  ;;  %3287 = vmatmul.mubr.msk.f32.gmra.mxu0 %vm874_vm4, %v730_v10  ;;  %v732_v13 = vpop.f32.mrf.mxu1 }
 0x1e4   : > { %1117 = vmatprep.subr.mxu1 %v3483_v24  ;;  %3266 = vmatprep.mubr.msk.f32.mxu1 %vm3484_vm3, %v3483_v24 }
 0x1e5   : > { %1118 = vmatpush1.msra.mxu1 %v3648_v53  ;;  %v855_v15 = vpop.f32.mrf.mxu0  ;;  %v735_v16 = vpop.f32.mrf.mxu1  ;;  %3289 = vmatprep.mubr.msk.f32.mxu0 %vm3484_vm3, %v3483_v24 }
 0x1e6   : > { %1119 = vmatprep.subr.mxu1 %v3483_v24  ;;  %3267 = vmatmul.mubr.msk.f32.gmra.mxu1 %vm874_vm4, %v855_v15 }
 0x1e7   : > { %1120 = vmatpush1.msra.mxu1 %v3657_v56  ;;  %v857_v20 = vpop.f32.mrf.mxu0  ;;  %3290 = vmatmul.mubr.msk.f32.gmra.mxu0 %vm874_vm4, %v735_v16  ;;  %v737_v21 = vpop.f32.mrf.mxu1 }
 0x1e8   : > { %1121 = vmatprep.subr.mxu1 %v3483_v24  ;;  %3269 = vmatprep.mubr.msk.f32.mxu1 %vm3484_vm3, %v3483_v24 }
 0x1e9   : > { %1122 = vmatpush1.msra.mxu1 %v3664_v58  ;;  %v860_v22 = vpop.f32.mrf.mxu0  ;;  %v740_v25 = vpop.f32.mrf.mxu1  ;;  %3292 = vmatprep.mubr.msk.f32.mxu0 %vm3484_vm3, %v3483_v24 }
 0x1ea   : > { %1123 = vmatprep.subr.mxu1 %v3483_v24  ;;  %3270 = vmatmul.mubr.msk.f32.gmra.mxu1 %vm874_vm4, %v860_v22 }
 0x1eb   : > { %1124 = vmatpush1.msra.mxu1 %v3673_v61  ;;  %v862_v27 = vpop.f32.mrf.mxu0  ;;  %3293 = vmatmul.mubr.msk.f32.gmra.mxu0 %vm874_vm4, %v740_v25  ;;  %v742_v31 = vpop.f32.mrf.mxu1 }
 0x1ec   : > { %1125 = vmatprep.subr.mxu1 %v3483_v24  ;;  %3272 = vmatprep.mubr.msk.f32.mxu1 %vm3484_vm3, %v3483_v24 }
 0x1ed   : > { %1126 = vmatpush1.msra.mxu1 %v3680_v63  ;;  %v865_v32 = vpop.f32.mrf.mxu0  ;;  %v745_v33 = vpop.f32.mrf.mxu1  ;;  %3295 = vmatprep.mubr.msk.f32.mxu0 %vm3484_vm3, %v3483_v24 }
 0x1ee   : > { %1127 = vmatprep.subr.mxu1 %v3483_v24  ;;  %3273 = vmatmul.mubr.msk.f32.gmra.mxu1 %vm874_vm4, %v865_v32 }
 0x1ef   : > { %1128 = vmatpush1.msra.mxu1 %v3687_v2  ;;  %v867_v35 = vpop.f32.mrf.mxu0  ;;  %3296 = vmatmul.mubr.msk.f32.gmra.mxu0 %vm874_vm4, %v745_v33  ;;  %v747_v36 = vpop.f32.mrf.mxu1 }
 0x1f0   : > { %1129 = vmatprep.subr.mxu1 %v3483_v24  ;;  %2935 = vmatprep.mubr.msk.f32.mxu1 %vm640_vm2, %v2925_v34 }
 0x1f1   : > { %1130 = vmatpush1.msra.mxu1 %v3695_v4  ;;  %3306 = vmatprep.mubr.msk.f32.mxu0 %vm3484_vm3, %v3483_v24 }
 0x1f2   : > { %1131 = vmatprep.subr.mxu1 %v3483_v24  ;;  %3300 = vmatprep.subr.mxu0 %v3483_v24 }
 0x1f3   : > { %1132 = vmatpush1.msra.mxu1 %v3703_v7  ;;  %3301 = vmatpush3.msra.mxu0 %v2942_v48  ;;  %v2951_v48 = vld [vmem:[%s4856_s3 + $0x100] sm:$0xff] }
 0x1f4   : > { %1133 = vmatprep.subr.mxu1 %v3483_v24  ;;  %3302 = vmatprep.subr.mxu0 %v3483_v24 }
 0x1f5   : > { %1134 = vmatpush1.msra.mxu1 %v3711_v9  ;;  %3303 = vmatpush3.msra.mxu0 %v2941_v50  ;;  %v2954_v50 = vld [vmem:[%s4856_s3 + $0x118] sm:$0xff] }
 0x1f6   : > { %1135 = vmatprep.subr.mxu1 %v3483_v24  ;;  %3304 = vmatprep.subr.mxu0 %v3483_v24 }
 0x1f7   : > { %1136 = vmatpush1.msra.mxu1 %v3719_v12  ;;  %3305 = vmatpush3.msra.mxu0 %v2940_v52  ;;  %v2953_v52 = vld [vmem:[%s4856_s3 + $0x110] sm:$0xff] }
 0x1f8   : > { %1137 = vmatprep.subr.mxu1 %v3483_v24  ;;  %1342 = vmatprep.subr.mxu0 %v3483_v24 }
 0x1f9   : > { %1138 = vmatpush1.msra.mxu1 %v3727_v14 }
 0x1fa   : > { %1139 = vmatprep.subr.mxu1 %v3483_v24 }
 0x1fb   : > { %1140 = vmatpush1.msra.mxu1 %v3734_v17 }
 0x1fc   : > { %1141 = vmatprep.subr.mxu1 %v3483_v24 }
 0x1fd   : > { %1142 = vmatpush1.msra.mxu1 %v3740_v18 }
 0x1fe   : > { %1163 = vmatprep.subr.mxu1 %v3483_v24 }
 0x1ff   : > { %2934 = vmatpush2.msk.msra.mxu1 %vm429_vm0, %v3742_v19 }
 0x200   : > { %1165 = vmatprep.subr.mxu1 %v3483_v24 }
 0x201   : > { %1166 = vmatpush2.msra.mxu1 %v3755_v23 }
 0x202   : > { %1167 = vmatprep.subr.mxu1 %v3483_v24 }
 0x203   : > { %1168 = vmatpush2.msra.mxu1 %v3765_v26 }
 0x204   : > { %1169 = vmatprep.subr.mxu1 %v3483_v24 }
 0x205   : > { %1170 = vmatpush2.msra.mxu1 %v3773_v28 }
 0x206   : > { %1171 = vmatprep.subr.mxu1 %v3483_v24 }
 0x207   : > { %1172 = vmatpush2.msra.mxu1 %v3779_v29 }
 0x208   : > { %1173 = vmatprep.subr.mxu1 %v3483_v24 }
 0x209   : > { %1174 = vmatpush2.msra.mxu1 %v3785_v30 }
 0x20a   : > { %1176 = vmatmul.mubr.f32.vlgmr.msra.gmra.mxu1 %v2924_v37  ;;  %3321 = vmatprep.subr.mxu1 %v3483_v24 }
 0x20b   : > { %2936 = vmatprep.mubr.msk.f32.mxu1 %vm640_vm2, %v2927_v38 }
 0x20e   : > { %1181 = vmatmul.mubr.f32.gmra.mxu1 %v2926_v39 }
 0x20f   : > { %2937 = vmatprep.mubr.msk.f32.mxu1 %vm640_vm2, %v2929_v40 }
 0x212   : > { %1186 = vmatmul.mubr.f32.gmra.mxu1 %v2928_v41 }
 0x213   : > { %2938 = vmatprep.mubr.msk.f32.mxu1 %vm640_vm2, %v2931_v42  ;;  %v2950_v42 = vld [vmem:[%s4856_s3 + $0xf8] sm:$0xff] }
 0x216   : > { %1191 = vmatmul.mubr.f32.gmra.mxu1 %v2930_v43 }
 0x217   : > { %2939 = vmatprep.mubr.msk.f32.mxu1 %vm640_vm2, %v2933_v44 }
 0x21a   : > { %1196 = vmatmul.mubr.f32.gmra.mxu1 %v2932_v45  ;;  %v2949_v45 = vld [vmem:[%s4856_s3 + $0xf0] sm:$0xff] }
 0x21b   : > { %3329 = vmatprep.mubr.msk.f32.mxu1 %vm3484_vm3, %v3483_v24 }
 0x29e   : > { %v956_v54 = vpop.f32.mrf.mxu1  ;;  %v1061_v55 = vpop.f32.mrf.mxu0 }
 0x29f   : > { %v4019_v57 = vadd.f32 %v1061_v55, %v956_v54  ;;  %v2956_v54 = vld [vmem:[%s4856_s3 + $0x128] sm:$0xff]  ;;  %v2955_v55 = vld [vmem:[%s4856_s3 + $0x120] sm:$0xff] }
 0x2a0   : > { %v3262_v59 = vpop.f32.mrf.mxu1  ;;  %v3285_v60 = vpop.f32.mrf.mxu0 }
 0x2a1   : > { %v2958_v59 = vld [vmem:[%s4856_s3 + $0x138] sm:$0xf]  ;;  %v2957_v60 = vld [vmem:[%s4856_s3 + $0x130] sm:$0xf] }
 0x2a2   : > { %v961_v62 = vpop.f32.mrf.mxu1 }
 0x2a3   : > { %v1066_v0 = vpop.f32.mrf.mxu0 }
 0x2a4   : > { %v3265_v1 = vpop.f32.mrf.mxu1  ;;  %v4021_v3 = vadd.f32 %v1066_v0, %v961_v62  ;;  %v2968_v62 = vld [vmem:[%s4857_s4 + $0x78] sm:$0xff]  ;;  %v2967_v0 = vld [vmem:[%s4857_s4 + $0x70] sm:$0xff] }
 0x2a5   : > { %v3288_v5 = vpop.f32.mrf.mxu0  ;;  %3322 = vmatpush3.msra.mxu1 %v2968_v62  ;;  %v2966_v1 = vld [vmem:[%s4857_s4 + $0x68] sm:$0xff] }
 0x2a6   : > { %v966_v6 = vpop.f32.mrf.mxu1  ;;  %3323 = vmatprep.subr.mxu1 %v3483_v24  ;;  %v2965_v5 = vld [vmem:[%s4857_s4 + $0x60] sm:$0xff]  ;;  %v2991_v62 = vld [vmem:[%s4857_s4 + $0x88] sm:$0xff] }
 0x2a7   : > { %v1071_v8 = vpop.f32.mrf.mxu0  ;;  %3324 = vmatpush3.msra.mxu1 %v2967_v0  ;;  %v2990_v0 = vld [vmem:[%s4857_s4 + $0x80] sm:$0xff] }
 0x2a8   : > { %v3268_v10 = vpop.f32.mrf.mxu1  ;;  %v4023_v11 = vadd.f32 %v1071_v8, %v966_v6  ;;  %3325 = vmatprep.subr.mxu1 %v3483_v24 }
 0x2a9   : > { %v3291_v13 = vpop.f32.mrf.mxu0  ;;  %3326 = vmatpush3.msra.mxu1 %v2966_v1 }
 0x2aa   : > { %v971_v15 = vpop.f32.mrf.mxu1  ;;  %3327 = vmatprep.subr.mxu1 %v3483_v24 }
 0x2ab   : > { %v1076_v16 = vpop.f32.mrf.mxu0  ;;  %3328 = vmatpush3.msra.mxu1 %v2965_v5 }
 0x2ac   : > { %v3271_v20 = vpop.f32.mrf.mxu1  ;;  %v4025_v21 = vadd.f32 %v1076_v16, %v971_v15  ;;  %1573 = vmatprep.subr.mxu1 %v3483_v24 }
 0x2ad   : > { %v3294_v22 = vpop.f32.mrf.mxu0 }
 0x2ae   : > { %v976_v25 = vpop.f32.mrf.mxu1 }
 0x2af   : > { %v1081_v27 = vpop.f32.mrf.mxu0 }
 0x2b0   : > { %v3274_v31 = vpop.f32.mrf.mxu1  ;;  %v4027_v32 = vadd.f32 %v1081_v27, %v976_v25 }
 0x2b1   : > { %v3297_v33 = vpop.f32.mrf.mxu0 }
 0x2ca   : > { %v1177_v34 = vpop.f32.mrf.mxu1 }
 0x2cb   : > { %3307 = vmatmul.mubr.msk.f32.vlgmr.msra.gmra.mxu0 %vm874_vm4, %v1177_v34 }
 0x2cc   : > { %1343 = vmatpush1.msra.mxu0 %v3630_v46  ;;  %v1179_v35 = vpop.f32.mrf.mxu1  ;;  %3309 = vmatprep.mubr.msk.f32.mxu0 %vm3484_vm3, %v3483_v24 }
 0x2cd   : > { %1344 = vmatprep.subr.mxu0 %v3483_v24 }
 0x2ce   : > { %1345 = vmatpush1.msra.mxu0 %v3634_v49  ;;  %v1182_v36 = vpop.f32.mrf.mxu1 }
 0x2cf   : > { %1346 = vmatprep.subr.mxu0 %v3483_v24  ;;  %3310 = vmatmul.mubr.msk.f32.gmra.mxu0 %vm874_vm4, %v1182_v36 }
 0x2d0   : > { %1347 = vmatpush1.msra.mxu0 %v3641_v51  ;;  %v1184_v37 = vpop.f32.mrf.mxu1  ;;  %3312 = vmatprep.mubr.msk.f32.mxu0 %vm3484_vm3, %v3483_v24 }
 0x2d1   : > { %1348 = vmatprep.subr.mxu0 %v3483_v24 }
 0x2d2   : > { %1349 = vmatpush1.msra.mxu0 %v3648_v53  ;;  %v1187_v38 = vpop.f32.mrf.mxu1 }
 0x2d3   : > { %1350 = vmatprep.subr.mxu0 %v3483_v24  ;;  %3313 = vmatmul.mubr.msk.f32.gmra.mxu0 %vm874_vm4, %v1187_v38 }
 0x2d4   : > { %1351 = vmatpush1.msra.mxu0 %v3657_v56  ;;  %v1189_v39 = vpop.f32.mrf.mxu1  ;;  %3315 = vmatprep.mubr.msk.f32.mxu0 %vm3484_vm3, %v3483_v24 }
 0x2d5   : > { %1352 = vmatprep.subr.mxu0 %v3483_v24 }
 0x2d6   : > { %1353 = vmatpush1.msra.mxu0 %v3664_v58  ;;  %v1192_v40 = vpop.f32.mrf.mxu1 }
 0x2d7   : > { %1354 = vmatprep.subr.mxu0 %v3483_v24  ;;  %3316 = vmatmul.mubr.msk.f32.gmra.mxu0 %vm874_vm4, %v1192_v40  ;;  %v2975_v40 = vld [vmem:[%s4856_s3 + $0x148] sm:$0xff] }
 0x2d8   : > { %1355 = vmatpush1.msra.mxu0 %v3673_v61  ;;  %v1194_v41 = vpop.f32.mrf.mxu1  ;;  %3318 = vmatprep.mubr.msk.f32.mxu0 %vm3484_vm3, %v3483_v24 }
 0x2d9   : > { %1356 = vmatprep.subr.mxu0 %v3483_v24 }
 0x2da   : > { %1357 = vmatpush1.msra.mxu0 %v3680_v63  ;;  %v1197_v43 = vpop.f32.mrf.mxu1 }
 0x2db   : > { %1358 = vmatprep.subr.mxu0 %v3483_v24  ;;  %3319 = vmatmul.mubr.msk.f32.gmra.mxu0 %vm874_vm4, %v1197_v43  ;;  %v2974_v43 = vld [vmem:[%s4856_s3 + $0x140] sm:$0xff] }
 0x2dc   : > { %1359 = vmatpush1.msra.mxu0 %v3687_v2  ;;  %v1199_v44 = vpop.f32.mrf.mxu1  ;;  %2960 = vmatprep.mubr.msk.f32.mxu0 %vm640_vm2, %v2950_v42 }
 0x2dd   : > { %1360 = vmatprep.subr.mxu0 %v3483_v24  ;;  %v2977_v44 = vld [vmem:[%s4856_s3 + $0x158] sm:$0xff] }
 0x2de   : > { %1361 = vmatpush1.msra.mxu0 %v3695_v4 }
 0x2df   : > { %1362 = vmatprep.subr.mxu0 %v3483_v24 }
 0x2e0   : > { %1363 = vmatpush1.msra.mxu0 %v3703_v7 }
 0x2e1   : > { %1364 = vmatprep.subr.mxu0 %v3483_v24 }
 0x2e2   : > { %1365 = vmatpush1.msra.mxu0 %v3711_v9 }
 0x2e3   : > { %1366 = vmatprep.subr.mxu0 %v3483_v24 }
 0x2e4   : > { %1367 = vmatpush1.msra.mxu0 %v3719_v12 }
 0x2e5   : > { %1368 = vmatprep.subr.mxu0 %v3483_v24 }
 0x2e6   : > { %1369 = vmatpush1.msra.mxu0 %v3727_v14 }
 0x2e7   : > { %1370 = vmatprep.subr.mxu0 %v3483_v24 }
 0x2e8   : > { %1371 = vmatpush1.msra.mxu0 %v3734_v17 }
 0x2e9   : > { %1372 = vmatprep.subr.mxu0 %v3483_v24 }
 0x2ea   : > { %1373 = vmatpush1.msra.mxu0 %v3740_v18 }
 0x2eb   : > { %1394 = vmatprep.subr.mxu0 %v3483_v24 }
 0x2ec   : > { %2959 = vmatpush2.msk.msra.mxu0 %vm429_vm0, %v3742_v19 }
 0x2ed   : > { %1396 = vmatprep.subr.mxu0 %v3483_v24 }
 0x2ee   : > { %1397 = vmatpush2.msra.mxu0 %v3755_v23 }
 0x2ef   : > { %1398 = vmatprep.subr.mxu0 %v3483_v24 }
 0x2f0   : > { %1399 = vmatpush2.msra.mxu0 %v3765_v26 }
 0x2f1   : > { %1400 = vmatprep.subr.mxu0 %v3483_v24 }
 0x2f2   : > { %1401 = vmatpush2.msra.mxu0 %v3773_v28 }
 0x2f3   : > { %1402 = vmatprep.subr.mxu0 %v3483_v24 }
 0x2f4   : > { %1403 = vmatpush2.msra.mxu0 %v3779_v29 }
 0x2f5   : > { %1404 = vmatprep.subr.mxu0 %v3483_v24 }
 0x2f6   : > { %1405 = vmatpush2.msra.mxu0 %v3785_v30 }
 0x2f7   : > { %1407 = vmatmul.mubr.f32.vlgmr.msra.gmra.mxu0 %v2949_v45  ;;  %3344 = vmatprep.subr.mxu0 %v3483_v24  ;;  %v2976_v45 = vld [vmem:[%s4856_s3 + $0x150] sm:$0xff] }
 0x2f8   : > { %2961 = vmatprep.mubr.msk.f32.mxu0 %vm640_vm2, %v2952_v47  ;;  %v2979_v47 = vld [vmem:[%s4856_s3 + $0x168] sm:$0xff] }
 0x2fb   : > { %1412 = vmatmul.mubr.f32.gmra.mxu0 %v2951_v48  ;;  %v2978_v48 = vld [vmem:[%s4856_s3 + $0x160] sm:$0xff] }
 0x2fc   : > { %2962 = vmatprep.mubr.msk.f32.mxu0 %vm640_vm2, %v2954_v50  ;;  %v2981_v50 = vld [vmem:[%s4856_s3 + $0x178] sm:$0xff] }
 0x2ff   : > { %1417 = vmatmul.mubr.f32.gmra.mxu0 %v2953_v52  ;;  %v2980_v52 = vld [vmem:[%s4856_s3 + $0x170] sm:$0xff] }
 0x300   : > { %2963 = vmatprep.mubr.msk.f32.mxu0 %vm640_vm2, %v2956_v54  ;;  %v2983_v54 = vld [vmem:[%s4856_s3 + $0x188] sm:$0xf] }
 0x303   : > { %1422 = vmatmul.mubr.f32.gmra.mxu0 %v2955_v55  ;;  %v2982_v55 = vld [vmem:[%s4856_s3 + $0x180] sm:$0xf] }
 0x304   : > { %2964 = vmatprep.mubr.msk.f32.mxu0 %vm640_vm2, %v2958_v59  ;;  %v2993_v59 = vld [vmem:[%s4857_s4 + $0x98] sm:$0xff] }
 0x305   : > { %3345 = vmatpush3.msra.mxu0 %v2993_v59  ;;  %v3016_v59 = vld [vmem:[%s4857_s4 + $0xa8] sm:$0xff] }
 0x306   : > { %3346 = vmatprep.subr.mxu0 %v3483_v24 }
 0x307   : > { %1427 = vmatmul.mubr.f32.gmra.mxu0 %v2957_v60  ;;  %v2992_v60 = vld [vmem:[%s4857_s4 + $0x90] sm:$0xff] }
 0x308   : > { %3352 = vmatprep.mubr.msk.f32.mxu0 %vm3484_vm3, %v3483_v24  ;;  %3347 = vmatpush3.msra.mxu0 %v2992_v60  ;;  %v3015_v60 = vld [vmem:[%s4857_s4 + $0xa0] sm:$0xff] }
 0x309   : > { %3348 = vmatprep.subr.mxu0 %v3483_v24 }
 0x30a   : > { %3349 = vmatpush3.msra.mxu0 %v2991_v62 }
 0x30b   : > { %3350 = vmatprep.subr.mxu0 %v3483_v24 }
 0x30c   : > { %3351 = vmatpush3.msra.mxu0 %v2990_v0 }
 0x30d   : > { %1804 = vmatprep.subr.mxu0 %v3483_v24 }
 0x38b   : > { %v1287_v6 = vpop.f32.mrf.mxu0 }
 0x38c   : > { %v4141_v8 = vadd.f32 %v1287_v6, %v4019_v57 }
 0x38d   : > { %v3308_v10 = vpop.f32.mrf.mxu0 }
 0x38f   : > { %v1292_v13 = vpop.f32.mrf.mxu0 }
 0x390   : > { %v4144_v15 = vadd.f32 %v1292_v13, %v4021_v3 }
 0x391   : > { %v3311_v16 = vpop.f32.mrf.mxu0 }
 0x393   : > { %v1297_v20 = vpop.f32.mrf.mxu0 }
 0x394   : > { %v4147_v22 = vadd.f32 %v1297_v20, %v4023_v11 }
 0x395   : > { %v3314_v25 = vpop.f32.mrf.mxu0 }
 0x397   : > { %v1302_v27 = vpop.f32.mrf.mxu0 }
 0x398   : > { %v4150_v31 = vadd.f32 %v1302_v27, %v4025_v21 }
 0x399   : > { %v3317_v33 = vpop.f32.mrf.mxu0 }
 0x39b   : > { %v1307_v34 = vpop.f32.mrf.mxu0 }
 0x39c   : > { %v4153_v57 = vadd.f32 %v1307_v34, %v4027_v32 }
 0x39d   : > { %v3320_v35 = vpop.f32.mrf.mxu0 }
 0x3b7   : > { %v1408_v36 = vpop.f32.mrf.mxu0 }
 0x3b8   : > { %3330 = vmatmul.mubr.msk.f32.vlgmr.msra.gmra.mxu1 %vm874_vm4, %v1408_v36 }
 0x3b9   : > { %1574 = vmatpush1.msra.mxu1 %v3630_v46  ;;  %v1410_v3 = vpop.f32.mrf.mxu0  ;;  %3332 = vmatprep.mubr.msk.f32.mxu1 %vm3484_vm3, %v3483_v24 }
 0x3ba   : > { %1575 = vmatprep.subr.mxu1 %v3483_v24 }
 0x3bb   : > { %1576 = vmatpush1.msra.mxu1 %v3634_v49  ;;  %v1413_v11 = vpop.f32.mrf.mxu0 }
 0x3bc   : > { %1577 = vmatprep.subr.mxu1 %v3483_v24  ;;  %3333 = vmatmul.mubr.msk.f32.gmra.mxu1 %vm874_vm4, %v1413_v11 }
 0x3bd   : > { %1578 = vmatpush1.msra.mxu1 %v3641_v51  ;;  %v1415_v21 = vpop.f32.mrf.mxu0  ;;  %3335 = vmatprep.mubr.msk.f32.mxu1 %vm3484_vm3, %v3483_v24 }
 0x3be   : > { %1579 = vmatprep.subr.mxu1 %v3483_v24 }
 0x3bf   : > { %1580 = vmatpush1.msra.mxu1 %v3648_v53  ;;  %v1418_v32 = vpop.f32.mrf.mxu0 }
 0x3c0   : > { %1581 = vmatprep.subr.mxu1 %v3483_v24  ;;  %3336 = vmatmul.mubr.msk.f32.gmra.mxu1 %vm874_vm4, %v1418_v32 }
 0x3c1   : > { %1582 = vmatpush1.msra.mxu1 %v3657_v56  ;;  %v1420_v37 = vpop.f32.mrf.mxu0  ;;  %3338 = vmatprep.mubr.msk.f32.mxu1 %vm3484_vm3, %v3483_v24 }
 0x3c2   : > { %1583 = vmatprep.subr.mxu1 %v3483_v24 }
 0x3c3   : > { %1584 = vmatpush1.msra.mxu1 %v3664_v58  ;;  %v1423_v38 = vpop.f32.mrf.mxu0 }
 0x3c4   : > { %1585 = vmatprep.subr.mxu1 %v3483_v24  ;;  %3339 = vmatmul.mubr.msk.f32.gmra.mxu1 %vm874_vm4, %v1423_v38  ;;  %v3000_v38 = vld [vmem:[%s4856_s3 + $0x198] sm:$0xff] }
 0x3c5   : > { %1586 = vmatpush1.msra.mxu1 %v3673_v61  ;;  %v1425_v39 = vpop.f32.mrf.mxu0  ;;  %3341 = vmatprep.mubr.msk.f32.mxu1 %vm3484_vm3, %v3483_v24 }
 0x3c6   : > { %1587 = vmatprep.subr.mxu1 %v3483_v24 }
 0x3c7   : > { %1588 = vmatpush1.msra.mxu1 %v3680_v63  ;;  %v1428_v41 = vpop.f32.mrf.mxu0 }
 0x3c8   : > { %1589 = vmatprep.subr.mxu1 %v3483_v24  ;;  %3342 = vmatmul.mubr.msk.f32.gmra.mxu1 %vm874_vm4, %v1428_v41  ;;  %v2999_v41 = vld [vmem:[%s4856_s3 + $0x190] sm:$0xff] }
 0x3c9   : > { %1590 = vmatpush1.msra.mxu1 %v3687_v2  ;;  %v1430_v42 = vpop.f32.mrf.mxu0  ;;  %2985 = vmatprep.mubr.msk.f32.mxu1 %vm640_vm2, %v2975_v40 }
 0x3ca   : > { %1591 = vmatprep.subr.mxu1 %v3483_v24  ;;  %v3002_v42 = vld [vmem:[%s4856_s3 + $0x1a8] sm:$0xff] }
 0x3cb   : > { %1592 = vmatpush1.msra.mxu1 %v3695_v4 }
 0x3cc   : > { %1593 = vmatprep.subr.mxu1 %v3483_v24 }
 0x3cd   : > { %1594 = vmatpush1.msra.mxu1 %v3703_v7 }
 0x3ce   : > { %1595 = vmatprep.subr.mxu1 %v3483_v24 }
 0x3cf   : > { %1596 = vmatpush1.msra.mxu1 %v3711_v9 }
 0x3d0   : > { %1597 = vmatprep.subr.mxu1 %v3483_v24 }
 0x3d1   : > { %1598 = vmatpush1.msra.mxu1 %v3719_v12 }
 0x3d2   : > { %1599 = vmatprep.subr.mxu1 %v3483_v24 }
 0x3d3   : > { %1600 = vmatpush1.msra.mxu1 %v3727_v14 }
 0x3d4   : > { %1601 = vmatprep.subr.mxu1 %v3483_v24 }
 0x3d5   : > { %1602 = vmatpush1.msra.mxu1 %v3734_v17 }
 0x3d6   : > { %1603 = vmatprep.subr.mxu1 %v3483_v24 }
 0x3d7   : > { %1604 = vmatpush1.msra.mxu1 %v3740_v18 }
 0x3d8   : > { %1625 = vmatprep.subr.mxu1 %v3483_v24 }
 0x3d9   : > { %2984 = vmatpush2.msk.msra.mxu1 %vm429_vm0, %v3742_v19 }
 0x3da   : > { %1627 = vmatprep.subr.mxu1 %v3483_v24 }
 0x3db   : > { %1628 = vmatpush2.msra.mxu1 %v3755_v23 }
 0x3dc   : > { %1629 = vmatprep.subr.mxu1 %v3483_v24 }
 0x3dd   : > { %1630 = vmatpush2.msra.mxu1 %v3765_v26 }
 0x3de   : > { %1631 = vmatprep.subr.mxu1 %v3483_v24 }
 0x3df   : > { %1632 = vmatpush2.msra.mxu1 %v3773_v28 }
 0x3e0   : > { %1633 = vmatprep.subr.mxu1 %v3483_v24 }
 0x3e1   : > { %1634 = vmatpush2.msra.mxu1 %v3779_v29 }
 0x3e2   : > { %1635 = vmatprep.subr.mxu1 %v3483_v24 }
 0x3e3   : > { %1636 = vmatpush2.msra.mxu1 %v3785_v30 }
 0x3e4   : > { %1638 = vmatmul.mubr.f32.vlgmr.msra.gmra.mxu1 %v2974_v43  ;;  %3367 = vmatprep.subr.mxu1 %v3483_v24  ;;  %v3001_v43 = vld [vmem:[%s4856_s3 + $0x1a0] sm:$0xff] }
 0x3e5   : > { %2986 = vmatprep.mubr.msk.f32.mxu1 %vm640_vm2, %v2977_v44  ;;  %v3004_v44 = vld [vmem:[%s4856_s3 + $0x1b8] sm:$0xff] }
 0x3e8   : > { %1643 = vmatmul.mubr.f32.gmra.mxu1 %v2976_v45  ;;  %v3003_v45 = vld [vmem:[%s4856_s3 + $0x1b0] sm:$0xff] }
 0x3e9   : > { %2987 = vmatprep.mubr.msk.f32.mxu1 %vm640_vm2, %v2979_v47  ;;  %v3006_v47 = vld [vmem:[%s4856_s3 + $0x1c8] sm:$0xff] }
 0x3ec   : > { %1648 = vmatmul.mubr.f32.gmra.mxu1 %v2978_v48  ;;  %v3005_v48 = vld [vmem:[%s4856_s3 + $0x1c0] sm:$0xff] }
 0x3ed   : > { %2988 = vmatprep.mubr.msk.f32.mxu1 %vm640_vm2, %v2981_v50  ;;  %v3008_v50 = vld [vmem:[%s4856_s3 + $0x1d8] sm:$0xf] }
 0x3f0   : > { %1653 = vmatmul.mubr.f32.gmra.mxu1 %v2980_v52  ;;  %v3007_v52 = vld [vmem:[%s4856_s3 + $0x1d0] sm:$0xf] }
 0x3f1   : > { %2989 = vmatprep.mubr.msk.f32.mxu1 %vm640_vm2, %v2983_v54  ;;  %v3018_v54 = vld [vmem:[%s4857_s4 + $0xb8] sm:$0xff] }
 0x3f2   : > { %3368 = vmatpush3.msra.mxu1 %v3018_v54  ;;  %v3041_v54 = vld [vmem:[%s4857_s4 + $0xc8] sm:$0xff] }
 0x3f3   : > { %3369 = vmatprep.subr.mxu1 %v3483_v24 }
 0x3f4   : > { %1658 = vmatmul.mubr.f32.gmra.mxu1 %v2982_v55  ;;  %v3017_v55 = vld [vmem:[%s4857_s4 + $0xb0] sm:$0xff] }
 0x3f5   : > { %3375 = vmatprep.mubr.msk.f32.mxu1 %vm3484_vm3, %v3483_v24  ;;  %3370 = vmatpush3.msra.mxu1 %v3017_v55  ;;  %v3040_v55 = vld [vmem:[%s4857_s4 + $0xc0] sm:$0xff] }
 0x3f6   : > { %3371 = vmatprep.subr.mxu1 %v3483_v24 }
 0x3f7   : > { %3372 = vmatpush3.msra.mxu1 %v3016_v59 }
 0x3f8   : > { %3373 = vmatprep.subr.mxu1 %v3483_v24 }
 0x3f9   : > { %3374 = vmatpush3.msra.mxu1 %v3015_v60 }
 0x3fa   : > { %2035 = vmatprep.subr.mxu1 %v3483_v24 }
 0x478   : > { %v1518_v1 = vpop.f32.mrf.mxu1 }
 0x479   : > { %v4267_v5 = vadd.f32 %v1518_v1, %v4141_v8 }
 0x47a   : > { %v3331_v6 = vpop.f32.mrf.mxu1 }
 0x47c   : > { %v1523_v10 = vpop.f32.mrf.mxu1 }
 0x47d   : > { %v4270_v13 = vadd.f32 %v1523_v10, %v4144_v15 }
 0x47e   : > { %v3334_v16 = vpop.f32.mrf.mxu1 }
 0x480   : > { %v1528_v20 = vpop.f32.mrf.mxu1 }
 0x481   : > { %v4273_v25 = vadd.f32 %v1528_v20, %v4147_v22 }
 0x482   : > { %v3337_v27 = vpop.f32.mrf.mxu1 }
 0x484   : > { %v1533_v33 = vpop.f32.mrf.mxu1 }
 0x485   : > { %v4276_v34 = vadd.f32 %v1533_v33, %v4150_v31 }
 0x486   : > { %v3340_v35 = vpop.f32.mrf.mxu1 }
 0x488   : > { %v1538_v36 = vpop.f32.mrf.mxu1 }
 0x489   : > { %v4279_v8 = vadd.f32 %v1538_v36, %v4153_v57 }
 0x48a   : > { %v3343_v3 = vpop.f32.mrf.mxu1 }
 0x4a4   : > { %v1639_v11 = vpop.f32.mrf.mxu1 }
 0x4a5   : > { %3353 = vmatmul.mubr.msk.f32.vlgmr.msra.gmra.mxu0 %vm874_vm4, %v1639_v11 }
 0x4a6   : > { %1805 = vmatpush1.msra.mxu0 %v3630_v46  ;;  %v1641_v15 = vpop.f32.mrf.mxu1  ;;  %3355 = vmatprep.mubr.msk.f32.mxu0 %vm3484_vm3, %v3483_v24 }
 0x4a7   : > { %1806 = vmatprep.subr.mxu0 %v3483_v24 }
 0x4a8   : > { %1807 = vmatpush1.msra.mxu0 %v3634_v49  ;;  %v1644_v22 = vpop.f32.mrf.mxu1 }
 0x4a9   : > { %1808 = vmatprep.subr.mxu0 %v3483_v24  ;;  %3356 = vmatmul.mubr.msk.f32.gmra.mxu0 %vm874_vm4, %v1644_v22 }
 0x4aa   : > { %1809 = vmatpush1.msra.mxu0 %v3641_v51  ;;  %v1646_v31 = vpop.f32.mrf.mxu1  ;;  %3358 = vmatprep.mubr.msk.f32.mxu0 %vm3484_vm3, %v3483_v24 }
 0x4ab   : > { %1810 = vmatprep.subr.mxu0 %v3483_v24 }
 0x4ac   : > { %1811 = vmatpush1.msra.mxu0 %v3648_v53  ;;  %v1649_v57 = vpop.f32.mrf.mxu1 }
 0x4ad   : > { %1812 = vmatprep.subr.mxu0 %v3483_v24  ;;  %3359 = vmatmul.mubr.msk.f32.gmra.mxu0 %vm874_vm4, %v1649_v57 }
 0x4ae   : > { %1813 = vmatpush1.msra.mxu0 %v3657_v56  ;;  %v1651_v21 = vpop.f32.mrf.mxu1  ;;  %3361 = vmatprep.mubr.msk.f32.mxu0 %vm3484_vm3, %v3483_v24 }
 0x4af   : > { %1814 = vmatprep.subr.mxu0 %v3483_v24 }
 0x4b0   : > { %1815 = vmatpush1.msra.mxu0 %v3664_v58  ;;  %v1654_v32 = vpop.f32.mrf.mxu1 }
 0x4b1   : > { %1816 = vmatprep.subr.mxu0 %v3483_v24  ;;  %3362 = vmatmul.mubr.msk.f32.gmra.mxu0 %vm874_vm4, %v1654_v32  ;;  %v3025_v32 = vld [vmem:[%s4856_s3 + $0x1e8] sm:$0xff] }
 0x4b2   : > { %1817 = vmatpush1.msra.mxu0 %v3673_v61  ;;  %v1656_v37 = vpop.f32.mrf.mxu1  ;;  %3364 = vmatprep.mubr.msk.f32.mxu0 %vm3484_vm3, %v3483_v24 }
 0x4b3   : > { %1818 = vmatprep.subr.mxu0 %v3483_v24 }
 0x4b4   : > { %1819 = vmatpush1.msra.mxu0 %v3680_v63  ;;  %v1659_v39 = vpop.f32.mrf.mxu1 }
 0x4b5   : > { %1820 = vmatprep.subr.mxu0 %v3483_v24  ;;  %3365 = vmatmul.mubr.msk.f32.gmra.mxu0 %vm874_vm4, %v1659_v39  ;;  %v3024_v39 = vld [vmem:[%s4856_s3 + $0x1e0] sm:$0xff] }
 0x4b6   : > { %1821 = vmatpush1.msra.mxu0 %v3687_v2  ;;  %v1661_v40 = vpop.f32.mrf.mxu1  ;;  %3010 = vmatprep.mubr.msk.f32.mxu0 %vm640_vm2, %v3000_v38 }
 0x4b7   : > { %1822 = vmatprep.subr.mxu0 %v3483_v24  ;;  %v3027_v40 = vld [vmem:[%s4856_s3 + $0x1f8] sm:$0xff] }
 0x4b8   : > { %1823 = vmatpush1.msra.mxu0 %v3695_v4 }
 0x4b9   : > { %1824 = vmatprep.subr.mxu0 %v3483_v24 }
 0x4ba   : > { %1825 = vmatpush1.msra.mxu0 %v3703_v7 }
 0x4bb   : > { %1826 = vmatprep.subr.mxu0 %v3483_v24 }
 0x4bc   : > { %1827 = vmatpush1.msra.mxu0 %v3711_v9 }
 0x4bd   : > { %1828 = vmatprep.subr.mxu0 %v3483_v24 }
 0x4be   : > { %1829 = vmatpush1.msra.mxu0 %v3719_v12 }
 0x4bf   : > { %1830 = vmatprep.subr.mxu0 %v3483_v24 }
 0x4c0   : > { %1831 = vmatpush1.msra.mxu0 %v3727_v14 }
 0x4c1   : > { %1832 = vmatprep.subr.mxu0 %v3483_v24 }
 0x4c2   : > { %1833 = vmatpush1.msra.mxu0 %v3734_v17 }
 0x4c3   : > { %1834 = vmatprep.subr.mxu0 %v3483_v24 }
 0x4c4   : > { %1835 = vmatpush1.msra.mxu0 %v3740_v18 }
 0x4c5   : > { %1856 = vmatprep.subr.mxu0 %v3483_v24 }
 0x4c6   : > { %3009 = vmatpush2.msk.msra.mxu0 %vm429_vm0, %v3742_v19 }
 0x4c7   : > { %1858 = vmatprep.subr.mxu0 %v3483_v24 }
 0x4c8   : > { %1859 = vmatpush2.msra.mxu0 %v3755_v23 }
 0x4c9   : > { %1860 = vmatprep.subr.mxu0 %v3483_v24 }
 0x4ca   : > { %1861 = vmatpush2.msra.mxu0 %v3765_v26 }
 0x4cb   : > { %1862 = vmatprep.subr.mxu0 %v3483_v24 }
 0x4cc   : > { %1863 = vmatpush2.msra.mxu0 %v3773_v28 }
 0x4cd   : > { %1864 = vmatprep.subr.mxu0 %v3483_v24 }
 0x4ce   : > { %1865 = vmatpush2.msra.mxu0 %v3779_v29 }
 0x4cf   : > { %1866 = vmatprep.subr.mxu0 %v3483_v24 }
 0x4d0   : > { %1867 = vmatpush2.msra.mxu0 %v3785_v30 }
 0x4d1   : > { %1869 = vmatmul.mubr.f32.vlgmr.msra.gmra.mxu0 %v2999_v41  ;;  %3390 = vmatprep.subr.mxu0 %v3483_v24  ;;  %v3026_v41 = vld [vmem:[%s4856_s3 + $0x1f0] sm:$0xff] }
 0x4d2   : > { %3011 = vmatprep.mubr.msk.f32.mxu0 %vm640_vm2, %v3002_v42  ;;  %v3029_v42 = vld [vmem:[%s4856_s3 + $0x208] sm:$0xff] }
 0x4d5   : > { %1874 = vmatmul.mubr.f32.gmra.mxu0 %v3001_v43  ;;  %v3028_v43 = vld [vmem:[%s4856_s3 + $0x200] sm:$0xff] }
 0x4d6   : > { %3012 = vmatprep.mubr.msk.f32.mxu0 %vm640_vm2, %v3004_v44  ;;  %v3031_v44 = vld [vmem:[%s4856_s3 + $0x218] sm:$0xff] }
 0x4d9   : > { %1879 = vmatmul.mubr.f32.gmra.mxu0 %v3003_v45  ;;  %v3030_v45 = vld [vmem:[%s4856_s3 + $0x210] sm:$0xff] }
 0x4da   : > { %3013 = vmatprep.mubr.msk.f32.mxu0 %vm640_vm2, %v3006_v47  ;;  %v3033_v47 = vld [vmem:[%s4856_s3 + $0x228] sm:$0xf] }
 0x4dd   : > { %1884 = vmatmul.mubr.f32.gmra.mxu0 %v3005_v48  ;;  %v3032_v48 = vld [vmem:[%s4856_s3 + $0x220] sm:$0xf] }
 0x4de   : > { %3014 = vmatprep.mubr.msk.f32.mxu0 %vm640_vm2, %v3008_v50  ;;  %v3043_v50 = vld [vmem:[%s4857_s4 + $0xd8] sm:$0xff] }
 0x4df   : > { %3391 = vmatpush3.msra.mxu0 %v3043_v50  ;;  %v3066_v50 = vld [vmem:[%s4857_s4 + $0xe8] sm:$0xff] }
 0x4e0   : > { %3392 = vmatprep.subr.mxu0 %v3483_v24 }
 0x4e1   : > { %1889 = vmatmul.mubr.f32.gmra.mxu0 %v3007_v52  ;;  %v3042_v52 = vld [vmem:[%s4857_s4 + $0xd0] sm:$0xff] }
 0x4e2   : > { %3398 = vmatprep.mubr.msk.f32.mxu0 %vm3484_vm3, %v3483_v24  ;;  %3393 = vmatpush3.msra.mxu0 %v3042_v52  ;;  %v3065_v52 = vld [vmem:[%s4857_s4 + $0xe0] sm:$0xff] }
 0x4e3   : > { %3394 = vmatprep.subr.mxu0 %v3483_v24 }
 0x4e4   : > { %3395 = vmatpush3.msra.mxu0 %v3041_v54 }
 0x4e5   : > { %3396 = vmatprep.subr.mxu0 %v3483_v24 }
 0x4e6   : > { %3397 = vmatpush3.msra.mxu0 %v3040_v55 }
 0x4e7   : > { %2266 = vmatprep.subr.mxu0 %v3483_v24 }
 0x565   : > { %v1749_v62 = vpop.f32.mrf.mxu0 }
 0x566   : > { %v4393_v0 = vadd.f32 %v1749_v62, %v4267_v5 }
 0x567   : > { %v3354_v1 = vpop.f32.mrf.mxu0 }
 0x569   : > { %v1754_v6 = vpop.f32.mrf.mxu0 }
 0x56a   : > { %v4396_v10 = vadd.f32 %v1754_v6, %v4270_v13 }
 0x56b   : > { %v3357_v16 = vpop.f32.mrf.mxu0 }
 0x56d   : > { %v1759_v20 = vpop.f32.mrf.mxu0 }
 0x56e   : > { %v4399_v27 = vadd.f32 %v1759_v20, %v4273_v25 }
 0x56f   : > { %v3360_v33 = vpop.f32.mrf.mxu0 }
 0x571   : > { %v1764_v35 = vpop.f32.mrf.mxu0 }
 0x572   : > { %v4402_v36 = vadd.f32 %v1764_v35, %v4276_v34 }
 0x573   : > { %v3363_v3 = vpop.f32.mrf.mxu0 }
 0x575   : > { %v1769_v11 = vpop.f32.mrf.mxu0 }
 0x576   : > { %v4405_v5 = vadd.f32 %v1769_v11, %v4279_v8 }
 0x577   : > { %v3366_v15 = vpop.f32.mrf.mxu0 }
 0x591   : > { %v1870_v22 = vpop.f32.mrf.mxu0 }
 0x592   : > { %3376 = vmatmul.mubr.msk.f32.vlgmr.msra.gmra.mxu1 %vm874_vm4, %v1870_v22 }
 0x593   : > { %2036 = vmatpush1.msra.mxu1 %v3630_v46  ;;  %v1872_v13 = vpop.f32.mrf.mxu0  ;;  %3378 = vmatprep.mubr.msk.f32.mxu1 %vm3484_vm3, %v3483_v24 }
 0x594   : > { %2037 = vmatprep.subr.mxu1 %v3483_v24 }
 0x595   : > { %2038 = vmatpush1.msra.mxu1 %v3634_v49  ;;  %v1875_v25 = vpop.f32.mrf.mxu0 }
 0x596   : > { %2039 = vmatprep.subr.mxu1 %v3483_v24  ;;  %3379 = vmatmul.mubr.msk.f32.gmra.mxu1 %vm874_vm4, %v1875_v25 }
 0x597   : > { %2040 = vmatpush1.msra.mxu1 %v3641_v51  ;;  %v1877_v34 = vpop.f32.mrf.mxu0  ;;  %3381 = vmatprep.mubr.msk.f32.mxu1 %vm3484_vm3, %v3483_v24 }
 0x598   : > { %2041 = vmatprep.subr.mxu1 %v3483_v24 }
 0x599   : > { %2042 = vmatpush1.msra.mxu1 %v3648_v53  ;;  %v1880_v8 = vpop.f32.mrf.mxu0 }
 0x59a   : > { %2043 = vmatprep.subr.mxu1 %v3483_v24  ;;  %3382 = vmatmul.mubr.msk.f32.gmra.mxu1 %vm874_vm4, %v1880_v8 }
 0x59b   : > { %2044 = vmatpush1.msra.mxu1 %v3657_v56  ;;  %v1882_v31 = vpop.f32.mrf.mxu0  ;;  %3384 = vmatprep.mubr.msk.f32.mxu1 %vm3484_vm3, %v3483_v24 }
 0x59c   : > { %2045 = vmatprep.subr.mxu1 %v3483_v24 }
 0x59d   : > { %2046 = vmatpush1.msra.mxu1 %v3664_v58  ;;  %v1885_v57 = vpop.f32.mrf.mxu0 }
 0x59e   : > { %2047 = vmatprep.subr.mxu1 %v3483_v24  ;;  %3385 = vmatmul.mubr.msk.f32.gmra.mxu1 %vm874_vm4, %v1885_v57  ;;  %v3050_v57 = vld [vmem:[%s4856_s3 + $0x238] sm:$0xff] }
 0x59f   : > { %2048 = vmatpush1.msra.mxu1 %v3673_v61  ;;  %v1887_v21 = vpop.f32.mrf.mxu0  ;;  %3387 = vmatprep.mubr.msk.f32.mxu1 %vm3484_vm3, %v3483_v24 }
 0x5a0   : > { %2049 = vmatprep.subr.mxu1 %v3483_v24 }
 0x5a1   : > { %2050 = vmatpush1.msra.mxu1 %v3680_v63  ;;  %v1890_v37 = vpop.f32.mrf.mxu0 }
 0x5a2   : > { %2051 = vmatprep.subr.mxu1 %v3483_v24  ;;  %3388 = vmatmul.mubr.msk.f32.gmra.mxu1 %vm874_vm4, %v1890_v37  ;;  %v3049_v37 = vld [vmem:[%s4856_s3 + $0x230] sm:$0xff] }
 0x5a3   : > { %2052 = vmatpush1.msra.mxu1 %v3687_v2  ;;  %v1892_v38 = vpop.f32.mrf.mxu0  ;;  %3035 = vmatprep.mubr.msk.f32.mxu1 %vm640_vm2, %v3025_v32 }
 0x5a4   : > { %2053 = vmatprep.subr.mxu1 %v3483_v24  ;;  %v3052_v38 = vld [vmem:[%s4856_s3 + $0x248] sm:$0xff] }
 0x5a5   : > { %2054 = vmatpush1.msra.mxu1 %v3695_v4 }
 0x5a6   : > { %2055 = vmatprep.subr.mxu1 %v3483_v24 }
 0x5a7   : > { %2056 = vmatpush1.msra.mxu1 %v3703_v7 }
 0x5a8   : > { %2057 = vmatprep.subr.mxu1 %v3483_v24 }
 0x5a9   : > { %2058 = vmatpush1.msra.mxu1 %v3711_v9 }
 0x5aa   : > { %2059 = vmatprep.subr.mxu1 %v3483_v24 }
 0x5ab   : > { %2060 = vmatpush1.msra.mxu1 %v3719_v12 }
 0x5ac   : > { %2061 = vmatprep.subr.mxu1 %v3483_v24 }
 0x5ad   : > { %2062 = vmatpush1.msra.mxu1 %v3727_v14 }
 0x5ae   : > { %2063 = vmatprep.subr.mxu1 %v3483_v24 }
 0x5af   : > { %2064 = vmatpush1.msra.mxu1 %v3734_v17 }
 0x5b0   : > { %2065 = vmatprep.subr.mxu1 %v3483_v24 }
 0x5b1   : > { %2066 = vmatpush1.msra.mxu1 %v3740_v18 }
 0x5b2   : > { %2087 = vmatprep.subr.mxu1 %v3483_v24 }
 0x5b3   : > { %3034 = vmatpush2.msk.msra.mxu1 %vm429_vm0, %v3742_v19 }
 0x5b4   : > { %2089 = vmatprep.subr.mxu1 %v3483_v24 }
 0x5b5   : > { %2090 = vmatpush2.msra.mxu1 %v3755_v23 }
 0x5b6   : > { %2091 = vmatprep.subr.mxu1 %v3483_v24 }
 0x5b7   : > { %2092 = vmatpush2.msra.mxu1 %v3765_v26 }
 0x5b8   : > { %2093 = vmatprep.subr.mxu1 %v3483_v24 }
 0x5b9   : > { %2094 = vmatpush2.msra.mxu1 %v3773_v28 }
 0x5ba   : > { %2095 = vmatprep.subr.mxu1 %v3483_v24 }
 0x5bb   : > { %2096 = vmatpush2.msra.mxu1 %v3779_v29 }
 0x5bc   : > { %2097 = vmatprep.subr.mxu1 %v3483_v24 }
 0x5bd   : > { %2098 = vmatpush2.msra.mxu1 %v3785_v30 }
 0x5be   : > { %2100 = vmatmul.mubr.f32.vlgmr.msra.gmra.mxu1 %v3024_v39  ;;  %3413 = vmatprep.subr.mxu1 %v3483_v24  ;;  %v3051_v39 = vld [vmem:[%s4856_s3 + $0x240] sm:$0xff] }
 0x5bf   : > { %3036 = vmatprep.mubr.msk.f32.mxu1 %vm640_vm2, %v3027_v40  ;;  %v3054_v40 = vld [vmem:[%s4856_s3 + $0x258] sm:$0xff] }
 0x5c2   : > { %2105 = vmatmul.mubr.f32.gmra.mxu1 %v3026_v41  ;;  %v3053_v41 = vld [vmem:[%s4856_s3 + $0x250] sm:$0xff] }
 0x5c3   : > { %3037 = vmatprep.mubr.msk.f32.mxu1 %vm640_vm2, %v3029_v42  ;;  %v3056_v42 = vld [vmem:[%s4856_s3 + $0x268] sm:$0xff] }
 0x5c6   : > { %2110 = vmatmul.mubr.f32.gmra.mxu1 %v3028_v43  ;;  %v3055_v43 = vld [vmem:[%s4856_s3 + $0x260] sm:$0xff] }
 0x5c7   : > { %3038 = vmatprep.mubr.msk.f32.mxu1 %vm640_vm2, %v3031_v44  ;;  %v3058_v44 = vld [vmem:[%s4856_s3 + $0x278] sm:$0xf] }
 0x5ca   : > { %2115 = vmatmul.mubr.f32.gmra.mxu1 %v3030_v45  ;;  %v3057_v45 = vld [vmem:[%s4856_s3 + $0x270] sm:$0xf] }
 0x5cb   : > { %3039 = vmatprep.mubr.msk.f32.mxu1 %vm640_vm2, %v3033_v47  ;;  %v3068_v47 = vld [vmem:[%s4857_s4 + $0xf8] sm:$0xff] }
 0x5cc   : > { %3414 = vmatpush3.msra.mxu1 %v3068_v47 }
 0x5cd   : > { %3415 = vmatprep.subr.mxu1 %v3483_v24 }
 0x5ce   : > { %2120 = vmatmul.mubr.f32.gmra.mxu1 %v3032_v48  ;;  %v3067_v48 = vld [vmem:[%s4857_s4 + $0xf0] sm:$0xff] }
 0x5cf   : > { %3421 = vmatprep.mubr.msk.f32.mxu1 %vm3484_vm3, %v3483_v24  ;;  %3416 = vmatpush3.msra.mxu1 %v3067_v48 }
 0x5d0   : > { %3417 = vmatprep.subr.mxu1 %v3483_v24 }
 0x5d1   : > { %3418 = vmatpush3.msra.mxu1 %v3066_v50 }
 0x5d2   : > { %3419 = vmatprep.subr.mxu1 %v3483_v24 }
 0x5d3   : > { %3420 = vmatpush3.msra.mxu1 %v3065_v52 }
 0x5d4   : > { %2497 = vmatprep.subr.mxu1 %v3483_v24 }
 0x652   : > { %v1980_v59 = vpop.f32.mrf.mxu1 }
 0x653   : > { %v4519_v60 = vadd.f32 %v1980_v59, %v4393_v0 }
 0x654   : > { %v3377_v62 = vpop.f32.mrf.mxu1 }
 0x656   : > { %v1985_v1 = vpop.f32.mrf.mxu1 }
 0x657   : > { %v4522_v6 = vadd.f32 %v1985_v1, %v4396_v10 }
 0x658   : > { %v3380_v16 = vpop.f32.mrf.mxu1 }
 0x65a   : > { %v1990_v20 = vpop.f32.mrf.mxu1 }
 0x65b   : > { %v4525_v33 = vadd.f32 %v1990_v20, %v4399_v27 }
 0x65c   : > { %v3383_v35 = vpop.f32.mrf.mxu1 }
 0x65e   : > { %v1995_v3 = vpop.f32.mrf.mxu1 }
 0x65f   : > { %v4528_v11 = vadd.f32 %v1995_v3, %v4402_v36 }
 0x660   : > { %v3386_v15 = vpop.f32.mrf.mxu1 }
 0x662   : > { %v2000_v22 = vpop.f32.mrf.mxu1 }
 0x663   : > { %v4531_v0 = vadd.f32 %v2000_v22, %v4405_v5 }
 0x664   : > { %v3389_v13 = vpop.f32.mrf.mxu1 }
 0x67e   : > { %v2101_v25 = vpop.f32.mrf.mxu1 }
 0x67f   : > { %3399 = vmatmul.mubr.msk.f32.vlgmr.msra.gmra.mxu0 %vm874_vm4, %v2101_v25 }
 0x680   : > { %2267 = vmatpush1.msra.mxu0 %v3630_v46  ;;  %v2103_v10 = vpop.f32.mrf.mxu1  ;;  %3401 = vmatprep.mubr.msk.f32.mxu0 %vm3484_vm3, %v3483_v24 }
 0x681   : > { %2268 = vmatprep.subr.mxu0 %v3483_v24 }
 0x682   : > { %2269 = vmatpush1.msra.mxu0 %v3634_v49  ;;  %v2106_v27 = vpop.f32.mrf.mxu1 }
 0x683   : > { %2270 = vmatprep.subr.mxu0 %v3483_v24  ;;  %3402 = vmatmul.mubr.msk.f32.gmra.mxu0 %vm874_vm4, %v2106_v27 }
 0x684   : > { %2271 = vmatpush1.msra.mxu0 %v3641_v51  ;;  %v2108_v36 = vpop.f32.mrf.mxu1  ;;  %3404 = vmatprep.mubr.msk.f32.mxu0 %vm3484_vm3, %v3483_v24 }
 0x685   : > { %2272 = vmatprep.subr.mxu0 %v3483_v24 }
 0x686   : > { %2273 = vmatpush1.msra.mxu0 %v3648_v53  ;;  %v2111_v5 = vpop.f32.mrf.mxu1 }
 0x687   : > { %2274 = vmatprep.subr.mxu0 %v3483_v24  ;;  %3405 = vmatmul.mubr.msk.f32.gmra.mxu0 %vm874_vm4, %v2111_v5 }
 0x688   : > { %2275 = vmatpush1.msra.mxu0 %v3657_v56  ;;  %v2113_v34 = vpop.f32.mrf.mxu1  ;;  %3407 = vmatprep.mubr.msk.f32.mxu0 %vm3484_vm3, %v3483_v24 }
 0x689   : > { %2276 = vmatprep.subr.mxu0 %v3483_v24 }
 0x68a   : > { %2277 = vmatpush1.msra.mxu0 %v3664_v58  ;;  %v2116_v8 = vpop.f32.mrf.mxu1 }
 0x68b   : > { %2278 = vmatprep.subr.mxu0 %v3483_v24  ;;  %3408 = vmatmul.mubr.msk.f32.gmra.mxu0 %vm874_vm4, %v2116_v8 }
 0x68c   : > { %2279 = vmatpush1.msra.mxu0 %v3673_v61  ;;  %v2118_v31 = vpop.f32.mrf.mxu1  ;;  %3410 = vmatprep.mubr.msk.f32.mxu0 %vm3484_vm3, %v3483_v24 }
 0x68d   : > { %2280 = vmatprep.subr.mxu0 %v3483_v24 }
 0x68e   : > { %2281 = vmatpush1.msra.mxu0 %v3680_v63  ;;  %v2121_v21 = vpop.f32.mrf.mxu1 }
 0x68f   : > { %2282 = vmatprep.subr.mxu0 %v3483_v24  ;;  %3411 = vmatmul.mubr.msk.f32.gmra.mxu0 %vm874_vm4, %v2121_v21 }
 0x690   : > { %2283 = vmatpush1.msra.mxu0 %v3687_v2  ;;  %v2123_v32 = vpop.f32.mrf.mxu1  ;;  %3060 = vmatprep.mubr.msk.f32.mxu0 %vm640_vm2, %v3050_v57 }
 0x691   : > { %2284 = vmatprep.subr.mxu0 %v3483_v24 }
 0x692   : > { %2285 = vmatpush1.msra.mxu0 %v3695_v4 }
 0x693   : > { %2286 = vmatprep.subr.mxu0 %v3483_v24 }
 0x694   : > { %2287 = vmatpush1.msra.mxu0 %v3703_v7 }
 0x695   : > { %2288 = vmatprep.subr.mxu0 %v3483_v24 }
 0x696   : > { %2289 = vmatpush1.msra.mxu0 %v3711_v9 }
 0x697   : > { %2290 = vmatprep.subr.mxu0 %v3483_v24 }
 0x698   : > { %2291 = vmatpush1.msra.mxu0 %v3719_v12 }
 0x699   : > { %2292 = vmatprep.subr.mxu0 %v3483_v24 }
 0x69a   : > { %2293 = vmatpush1.msra.mxu0 %v3727_v14 }
 0x69b   : > { %2294 = vmatprep.subr.mxu0 %v3483_v24 }
 0x69c   : > { %2295 = vmatpush1.msra.mxu0 %v3734_v17 }
 0x69d   : > { %2296 = vmatprep.subr.mxu0 %v3483_v24 }
 0x69e   : > { %2297 = vmatpush1.msra.mxu0 %v3740_v18 }
 0x69f   : > { %2318 = vmatprep.subr.mxu0 %v3483_v24 }
 0x6a0   : > { %3059 = vmatpush2.msk.msra.mxu0 %vm429_vm0, %v3742_v19 }
 0x6a1   : > { %2320 = vmatprep.subr.mxu0 %v3483_v24 }
 0x6a2   : > { %2321 = vmatpush2.msra.mxu0 %v3755_v23 }
 0x6a3   : > { %2322 = vmatprep.subr.mxu0 %v3483_v24 }
 0x6a4   : > { %2323 = vmatpush2.msra.mxu0 %v3765_v26 }
 0x6a5   : > { %2324 = vmatprep.subr.mxu0 %v3483_v24 }
 0x6a6   : > { %2325 = vmatpush2.msra.mxu0 %v3773_v28 }
 0x6a7   : > { %2326 = vmatprep.subr.mxu0 %v3483_v24 }
 0x6a8   : > { %2327 = vmatpush2.msra.mxu0 %v3779_v29 }
 0x6a9   : > { %2328 = vmatprep.subr.mxu0 %v3483_v24 }
 0x6aa   : > { %2329 = vmatpush2.msra.mxu0 %v3785_v30 }
 0x6ab   : > { %2331 = vmatmul.mubr.f32.vlgmr.msra.gmra.mxu0 %v3049_v37  ;;  %3436 = vmatprep.subr.mxu0 %v3483_v24 }
 0x6ac   : > { %3061 = vmatprep.mubr.msk.f32.mxu0 %vm640_vm2, %v3052_v38 }
 0x6af   : > { %2336 = vmatmul.mubr.f32.gmra.mxu0 %v3051_v39 }
 0x6b0   : > { %3062 = vmatprep.mubr.msk.f32.mxu0 %vm640_vm2, %v3054_v40 }
 0x6b3   : > { %2341 = vmatmul.mubr.f32.gmra.mxu0 %v3053_v41 }
 0x6b4   : > { %3063 = vmatprep.mubr.msk.f32.mxu0 %vm640_vm2, %v3056_v42 }
 0x6b7   : > { %2346 = vmatmul.mubr.f32.gmra.mxu0 %v3055_v43 }
 0x6b8   : > { %3064 = vmatprep.mubr.msk.f32.mxu0 %vm640_vm2, %v3058_v44 }
 0x6bb   : > { %2351 = vmatmul.mubr.f32.gmra.mxu0 %v3057_v45 }
 0x6bc   : > { %3444 = vmatprep.mubr.msk.f32.mxu0 %vm3484_vm3, %v3483_v24 }
 0x73f   : > { %v2211_v54 = vpop.f32.mrf.mxu0 }
 0x740   : > { %v4645_v55 = vadd.f32 %v2211_v54, %v4519_v60 }
 0x741   : > { %v3400_v59 = vpop.f32.mrf.mxu0 }
 0x742   : > { %v3099_v59 = vld [vmem:[%s4858_s5] ss:$0 sm:$0xff] }
 0x743   : > { %v2216_v62 = vpop.f32.mrf.mxu0 }
 0x744   : > { %v4648_v1 = vadd.f32 %v2216_v62, %v4522_v6 }
 0x745   : > { %v3403_v16 = vpop.f32.mrf.mxu0 }
 0x747   : > { %v2221_v20 = vpop.f32.mrf.mxu0 }
 0x748   : > { %v4651_v35 = vadd.f32 %v2221_v20, %v4525_v33 }
 0x749   : > { %v3406_v3 = vpop.f32.mrf.mxu0 }
 0x74a   : > { %v2721_v3 = vld [vmem:[%s4859_s6] sm:$0xff] }
 0x74b   : > { %v2226_v15 = vpop.f32.mrf.mxu0 }
 0x74c   : > { %v4654_v22 = vadd.f32 %v2226_v15, %v4528_v11 }
 0x74d   : > { %v3409_v13 = vpop.f32.mrf.mxu0 }
 0x74f   : > { %v2231_v25 = vpop.f32.mrf.mxu0 }
 0x750   : > { %v4657_v60 = vadd.f32 %v2231_v25, %v4531_v0 }
 0x751   : > { %v3412_v10 = vpop.f32.mrf.mxu0 }
 0x752   : > { %v2722_v10 = vld [vmem:[%s4859_s6 + $0x8] sm:$0xff] }
 0x76b   : > { %v2332_v27 = vpop.f32.mrf.mxu0 }
 0x76c   : > { %3422 = vmatmul.mubr.msk.f32.vlgmr.msra.gmra.mxu1 %vm874_vm4, %v2332_v27  ;;  %v3102_v27 = vld [vmem:[%s4859_s6 + $0x30] sm:$0xff] }
 0x76d   : > { %2498 = vmatpush1.msra.mxu1 %v3630_v46  ;;  %v2334_v6 = vpop.f32.mrf.mxu0  ;;  %3424 = vmatprep.mubr.msk.f32.mxu1 %vm3484_vm3, %v3483_v24 }
 0x76e   : > { %2499 = vmatprep.subr.mxu1 %v3483_v24 }
 0x76f   : > { %2500 = vmatpush1.msra.mxu1 %v3634_v49  ;;  %v2337_v33 = vpop.f32.mrf.mxu0 }
 0x770   : > { %2501 = vmatprep.subr.mxu1 %v3483_v24  ;;  %3425 = vmatmul.mubr.msk.f32.gmra.mxu1 %vm874_vm4, %v2337_v33 }
 0x771   : > { %2502 = vmatpush1.msra.mxu1 %v3641_v51  ;;  %v2339_v11 = vpop.f32.mrf.mxu0  ;;  %3427 = vmatprep.mubr.msk.f32.mxu1 %vm3484_vm3, %v3483_v24 }
 0x772   : > { %2503 = vmatprep.subr.mxu1 %v3483_v24 }
 0x773   : > { %2504 = vmatpush1.msra.mxu1 %v3648_v53  ;;  %v2342_v46 = vpop.f32.mrf.mxu0 }
 0x774   : > { %2505 = vmatprep.subr.mxu1 %v3483_v24  ;;  %3428 = vmatmul.mubr.msk.f32.gmra.mxu1 %vm874_vm4, %v2342_v46 }
 0x775   : > { %2506 = vmatpush1.msra.mxu1 %v3657_v56  ;;  %v2344_v49 = vpop.f32.mrf.mxu0  ;;  %3430 = vmatprep.mubr.msk.f32.mxu1 %vm3484_vm3, %v3483_v24  ;;  %v3075_v56 = vld [vmem:[%s4856_s3 + $0x288] sm:$0xff] }
 0x776   : > { %2507 = vmatprep.subr.mxu1 %v3483_v24 }
 0x777   : > { %2508 = vmatpush1.msra.mxu1 %v3664_v58  ;;  %v2347_v51 = vpop.f32.mrf.mxu0 }
 0x778   : > { %2509 = vmatprep.subr.mxu1 %v3483_v24  ;;  %3431 = vmatmul.mubr.msk.f32.gmra.mxu1 %vm874_vm4, %v2347_v51 }
 0x779   : > { %2510 = vmatpush1.msra.mxu1 %v3673_v61  ;;  %v2349_v53 = vpop.f32.mrf.mxu0  ;;  %3433 = vmatprep.mubr.msk.f32.mxu1 %vm3484_vm3, %v3483_v24 }
 0x77a   : > { %2511 = vmatprep.subr.mxu1 %v3483_v24 }
 0x77b   : > { %2512 = vmatpush1.msra.mxu1 %v3680_v63  ;;  %v2352_v58 = vpop.f32.mrf.mxu0  ;;  %v3074_v63 = vld [vmem:[%s4856_s3 + $0x280] sm:$0xff] }
 0x77c   : > { %2513 = vmatprep.subr.mxu1 %v3483_v24  ;;  %3434 = vmatmul.mubr.msk.f32.gmra.mxu1 %vm874_vm4, %v2352_v58  ;;  %v2723_v58 = vld [vmem:[%s4859_s6 + $0x10] sm:$0xff] }
 0x77d   : > { %2514 = vmatpush1.msra.mxu1 %v3687_v2  ;;  %v2354_v61 = vpop.f32.mrf.mxu0  ;;  %3085 = vmatprep.mubr.msk.f32.mxu1 %vm640_vm2, %v3075_v56  ;;  %v3077_v2 = vld [vmem:[%s4856_s3 + $0x298] sm:$0xff] }
 0x77e   : > { %2515 = vmatprep.subr.mxu1 %v3483_v24  ;;  %v3103_v61 = vld [vmem:[%s4859_s6 + $0x38] sm:$0xff] }
 0x77f   : > { %2516 = vmatpush1.msra.mxu1 %v3695_v4  ;;  %v3076_v4 = vld [vmem:[%s4856_s3 + $0x290] sm:$0xff] }
 0x780   : > { %2517 = vmatprep.subr.mxu1 %v3483_v24 }
 0x781   : > { %2518 = vmatpush1.msra.mxu1 %v3703_v7  ;;  %v3079_v7 = vld [vmem:[%s4856_s3 + $0x2a8] sm:$0xff] }
 0x782   : > { %2519 = vmatprep.subr.mxu1 %v3483_v24 }
 0x783   : > { %2520 = vmatpush1.msra.mxu1 %v3711_v9  ;;  %v3078_v9 = vld [vmem:[%s4856_s3 + $0x2a0] sm:$0xff] }
 0x784   : > { %2521 = vmatprep.subr.mxu1 %v3483_v24 }
 0x785   : > { %2522 = vmatpush1.msra.mxu1 %v3719_v12  ;;  %v3081_v12 = vld [vmem:[%s4856_s3 + $0x2b8] sm:$0xff] }
 0x786   : > { %2523 = vmatprep.subr.mxu1 %v3483_v24 }
 0x787   : > { %2524 = vmatpush1.msra.mxu1 %v3727_v14  ;;  %v3080_v14 = vld [vmem:[%s4856_s3 + $0x2b0] sm:$0xff] }
 0x788   : > { %2525 = vmatprep.subr.mxu1 %v3483_v24 }
 0x789   : > { %2526 = vmatpush1.msra.mxu1 %v3734_v17  ;;  %v3083_v17 = vld [vmem:[%s4856_s3 + $0x2c8] sm:$0xf] }
 0x78a   : > { %2527 = vmatprep.subr.mxu1 %v3483_v24 }
 0x78b   : > { %2528 = vmatpush1.msra.mxu1 %v3740_v18  ;;  %v3082_v18 = vld [vmem:[%s4856_s3 + $0x2c0] sm:$0xf] }
 0x78c   : > { %2549 = vmatprep.subr.mxu1 %v3483_v24 }
 0x78d   : > { %3084 = vmatpush2.msk.msra.mxu1 %vm429_vm0, %v3742_v19  ;;  %v3093_v19 = vld [vmem:[%s4857_s4 + $0x118] sm:$0xff] }
 0x78e   : > { %2551 = vmatprep.subr.mxu1 %v3483_v24  ;;  %3437 = vmatpush3.msra.mxu0 %v3093_v19 }
 0x78f   : > { %2552 = vmatpush2.msra.mxu1 %v3755_v23  ;;  %v3092_v23 = vld [vmem:[%s4857_s4 + $0x110] sm:$0xff]  ;;  %3438 = vmatprep.subr.mxu0 %v3483_v24 }
 0x790   : > { %2553 = vmatprep.subr.mxu1 %v3483_v24  ;;  %3439 = vmatpush3.msra.mxu0 %v3092_v23 }
 0x791   : > { %2554 = vmatpush2.msra.mxu1 %v3765_v26  ;;  %v3091_v26 = vld [vmem:[%s4857_s4 + $0x108] sm:$0xff]  ;;  %3440 = vmatprep.subr.mxu0 %v3483_v24 }
 0x792   : > { %2555 = vmatprep.subr.mxu1 %v3483_v24  ;;  %3441 = vmatpush3.msra.mxu0 %v3091_v26 }
 0x793   : > { %2556 = vmatpush2.msra.mxu1 %v3773_v28  ;;  %v3090_v28 = vld [vmem:[%s4857_s4 + $0x100] sm:$0xff]  ;;  %3442 = vmatprep.subr.mxu0 %v3483_v24 }
 0x794   : > { %2557 = vmatprep.subr.mxu1 %v3483_v24  ;;  %3443 = vmatpush3.msra.mxu0 %v3090_v28  ;;  %v3104_v28 = vld [vmem:[%s4859_s6 + $0x40] sm:$0xff] }
 0x795   : > { %2558 = vmatpush2.msra.mxu1 %v3779_v29 }
 0x796   : > { %2559 = vmatprep.subr.mxu1 %v3483_v24 }
 0x797   : > { %2560 = vmatpush2.msra.mxu1 %v3785_v30 }
 0x798   : > { %2562 = vmatmul.mubr.f32.vlgmr.msra.gmra.mxu1 %v3074_v63 }
 0x799   : > { %3086 = vmatprep.mubr.msk.f32.mxu1 %vm640_vm2, %v3077_v2 }
 0x79c   : > { %2567 = vmatmul.mubr.f32.gmra.mxu1 %v3076_v4 }
 0x79d   : > { %3087 = vmatprep.mubr.msk.f32.mxu1 %vm640_vm2, %v3079_v7 }
 0x7a0   : > { %2572 = vmatmul.mubr.f32.gmra.mxu1 %v3078_v9 }
 0x7a1   : > { %3088 = vmatprep.mubr.msk.f32.mxu1 %vm640_vm2, %v3081_v12 }
 0x7a4   : > { %2577 = vmatmul.mubr.f32.gmra.mxu1 %v3080_v14 }
 0x7a5   : > { %3089 = vmatprep.mubr.msk.f32.mxu1 %vm640_vm2, %v3083_v17 }
 0x7a8   : > { %2582 = vmatmul.mubr.f32.gmra.mxu1 %v3082_v18 }
 0x82c   : > { %v2442_v29 = vpop.f32.mrf.mxu1 }
 0x82d   : > { %v2466_v30 = vadd.f32 %v2442_v29, %v4645_v55 }
 0x82e   : > { %v3423_v0 = vpop.f32.mrf.mxu1 }
 0x830   : > { %v2447_v36 = vpop.f32.mrf.mxu1 }
 0x831   : > { %v2467_v5 = vadd.f32 %v2447_v36, %v4648_v1 }
 0x832   : > { %v3426_v34 = vpop.f32.mrf.mxu1 }
 0x834   : > { %v2452_v8 = vpop.f32.mrf.mxu1 }
 0x835   : > { %v2468_v31 = vadd.f32 %v2452_v8, %v4651_v35 }
 0x836   : > { %v3429_v57 = vpop.f32.mrf.mxu1 }
 0x838   : > { %v2457_v21 = vpop.f32.mrf.mxu1 }
 0x839   : > { %v2469_v32 = vadd.f32 %v2457_v21, %v4654_v22 }
 0x83a   : > { %v3432_v37 = vpop.f32.mrf.mxu1 }
 0x83c   : > { %v2462_v38 = vpop.f32.mrf.mxu1 }
 0x83d   : > { %v4771_v39 = vadd.f32 %v2462_v38, %v4657_v60  ;;  %v2725_v38 = vld [vmem:[%s4859_s6 + $0x20] sm:$0xf] }
 0x83e   : > { %v3435_v40 = vpop.f32.mrf.mxu1 }
 0x83f   : > { %v3105_v40 = vld [vmem:[%s4859_s6 + $0x48] sm:$0xf] }
 0x858   : > { %v2563_v41 = vpop.f32.mrf.mxu1 }
 0x859   : > { %3445 = vmatmul.mubr.msk.f32.vlgmr.msra.gmra.mxu0 %vm874_vm4, %v2563_v41 }
 0x85a   : > { %v2565_v42 = vpop.f32.mrf.mxu1  ;;  %3447 = vmatprep.mubr.msk.f32.mxu0 %vm3484_vm3, %v3483_v24 }
 0x85c   : > { %v2568_v43 = vpop.f32.mrf.mxu1 }
 0x85d   : > { %3448 = vmatmul.mubr.msk.f32.gmra.mxu0 %vm874_vm4, %v2568_v43 }
 0x85e   : > { %v2570_v44 = vpop.f32.mrf.mxu1  ;;  %3450 = vmatprep.mubr.msk.f32.mxu0 %vm3484_vm3, %v3483_v24 }
 0x860   : > { %v2573_v45 = vpop.f32.mrf.mxu1 }
 0x861   : > { %3451 = vmatmul.mubr.msk.f32.gmra.mxu0 %vm874_vm4, %v2573_v45 }
 0x862   : > { %v2575_v47 = vpop.f32.mrf.mxu1  ;;  %3453 = vmatprep.mubr.msk.f32.mxu0 %vm3484_vm3, %v3483_v24 }
 0x864   : > { %v2578_v48 = vpop.f32.mrf.mxu1 }
 0x865   : > { %3454 = vmatmul.mubr.msk.f32.gmra.mxu0 %vm874_vm4, %v2578_v48 }
 0x866   : > { %v2580_v50 = vpop.f32.mrf.mxu1  ;;  %3456 = vmatprep.mubr.msk.f32.mxu0 %vm3484_vm3, %v3483_v24  ;;  %v3101_v24 = vld [vmem:[%s4859_s6 + $0x28] sm:$0xff] }
 0x868   : > { %v2583_v52 = vpop.f32.mrf.mxu1 }
 0x869   : > { %3457 = vmatmul.mubr.msk.f32.gmra.mxu0 %vm874_vm4, %v2583_v52 }
 0x86a   : > { %v2585_v54 = vpop.f32.mrf.mxu1 }
 0x919   : > { %v2673_v55 = vpop.f32.mrf.mxu0 }
 0x91a   : > { %v2697_v62 = vadd.f32 %v2673_v55, %v2466_v30  ;;  %v2724_v30 = vld [vmem:[%s4859_s6 + $0x18] sm:$0xff] }
 0x91b   : > { %v3446_v1 = vpop.f32.mrf.mxu0 }
 0x91c   : > { %v2709_v16 = vadd.f32 %v3099_v59, %v2697_v62 }
 0x91d   : > { %v2678_v20 = vpop.f32.mrf.mxu0 }
 0x91e   : > { %v2714_v35 = vmax.f32 %v2709_v16, 0.0  ;;  %v2698_v15 = vadd.f32 %v2678_v20, %v2467_v5 }
 0x91f   : > { %v3449_v22 = vpop.f32.mrf.mxu0 }
 0x920   : > { %v2710_v13 = vadd.f32 %v3099_v59, %v2698_v15  ;;  %v2726_v25 = vmul.f32 %v2721_v3, %v2714_v35  ;;  %v2765_v60 = vmul.f32 %v3101_v24, %v2714_v35 }
 0x921   : > { %v2683_v6 = vpop.f32.mrf.mxu0 }
 0x922   : > { %v2715_v33 = vmax.f32 %v2710_v13, 0.0  ;;  %v2699_v11 = vadd.f32 %v2683_v6, %v2468_v31  ;;  %v2770_v56 = vsel %vm2731_vm5, %v2765_v60, 0.0  ;;  %v2732_v2 = vsel %vm2731_vm5, %v2726_v25, 0.0 }
 0x923   : > { %v3452_v46 = vpop.f32.mrf.mxu0 }
 0x924   : > { %v2727_v49 = vmul.f32 %v2722_v10, %v2715_v33  ;;  %v2766_v51 = vmul.f32 %v3102_v27, %v2715_v33  ;;  %v2711_v53 = vadd.f32 %v3099_v59, %v2699_v11  ;;  %v2751_v10 = vld [vmem:[%s4860_s7] ss:$2 sm:$0xff]  ;;  %v3100_v27 = vld [vmem:[%s4860_s7 + $0x10] ss:$2 sm:$0x1f] }
 0x925   : > { %v2688_v63 = vpop.f32.mrf.mxu0  ;;  %v2720_v33 = vld [vmem:[%s4861_s8 + $0x8] sm:$0x1f] }
 0x926   : > { %v2771_v4 = vsel %vm2731_vm5, %v2766_v51, 0.0  ;;  %v2716_v7 = vmax.f32 %v2711_v53, 0.0  ;;  %v2700_v9 = vadd.f32 %v2688_v63, %v2469_v32  ;;  %v2733_v12 = vsel %vm2731_vm5, %v2727_v49, 0.0  ;;  %v2719_v49 = vld [vmem:[%s4861_s8] sm:$0xff] }
 0x927   : > { %v3455_v14 = vpop.f32.mrf.mxu0  ;;  %v2734_v17 = vadd.f32 %v2733_v12, %v2732_v2  ;;  %v2772_v18 = vadd.f32 %v2771_v4, %v2770_v56  ;;  %v3106_v51 = vld [vmem:[%s4860_s7 + $0x1] ss:$2 sm:$0xff]  ;;  %v3107_v53 = vld [vmem:[%s4860_s7 + $0x11] ss:$2 sm:$0x1f] }
 0x928   : > { %v2728_v19 = vmul.f32 %v2723_v58, %v2716_v7  ;;  %v2767_v23 = vmul.f32 %v3103_v61, %v2716_v7  ;;  %v2712_v26 = vadd.f32 %v3099_v59, %v2700_v9  ;;  %v2800_v58 = vlaneseq }
 0x929   : > { %v2693_v29 = vpop.f32.mrf.mxu0 }
 0x92a   : > { %v2717_v0 = vmax.f32 %v2712_v26, 0.0  ;;  %v2701_v36 = vadd.f32 %v2693_v29, %v4771_v39  ;;  %v2735_v5 = vsel %vm2731_vm5, %v2728_v19, 0.0  ;;  %v2773_v34 = vsel %vm2731_vm5, %v2767_v23, 0.0 }
 0x92b   : > { %v3458_v8 = vpop.f32.mrf.mxu0  ;;  %v2736_v31 = vadd.f32 %v2735_v5, %v2734_v17  ;;  %v2774_v57 = vadd.f32 %v2773_v34, %v2772_v18  ;;  %vm2802_vm7 = vcmp.lt.s32.totalorder %v2800_v58, 544 }
 0x92c   : > { %v2768_v21 = vmul.f32 %v3104_v28, %v2717_v0  ;;  %v2713_v32 = vadd.f32 %v3099_v59, %v2701_v36  ;;  %v2729_v37 = vmul.f32 %v2724_v30, %v2717_v0 }
 0x92e   : > { %v2718_v41 = vmax.f32 %v2713_v32, 0.0  ;;  %v2737_v39 = vsel %vm2731_vm5, %v2729_v37, 0.0  ;;  %v2775_v42 = vsel %vm2731_vm5, %v2768_v21, 0.0 }
 0x92f   : > { %v2738_v43 = vadd.f32 %v2737_v39, %v2736_v31  ;;  %v2776_v44 = vadd.f32 %v2775_v42, %v2774_v57 }
 0x930   : > { %v2730_v45 = vmul.f32 %v2725_v38, %v2718_v41  ;;  %v2769_v47 = vmul.f32 %v3105_v40, %v2718_v41 }
 0x932   : > { %v2740_v48 = vsel %vm2739_vm6, %v2730_v45, 0.0  ;;  %v2777_v50 = vsel %vm2739_vm6, %v2769_v47, 0.0 }
 0x933   : > { %v2741_v52 = vadd.f32 %v2740_v48, %v2738_v43  ;;  %v2778_v54 = vadd.f32 %v2777_v50, %v2776_v44 }
 0x935   : > { %2742 = vadd.xlane.f32.xlu0 %v2741_v52 }
 0x939   : > { %2779 = vadd.xlane.f32.xlu0 %v2778_v54 }
 0x9be   : > { %v2743_v55 = vpop.xlane.xlu0 %2742 }
 0x9bf   : > { %v2744_v59 = vrot.slane %v2743_v55, 4 }
 0x9c1   : > { %v2745_v62 = vadd.f32 %v2744_v59, %v2743_v55 }
 0x9c2   : > { %v2780_v1 = vpop.xlane.xlu0 %2779 }
 0x9c3   : > { %v2746_v16 = vrot.slane %v2745_v62, 2  ;;  %v2781_v20 = vrot.slane %v2780_v1, 4 }
 0x9c5   : > { %v2782_v35 = vadd.f32 %v2781_v20, %v2780_v1  ;;  %v2747_v3 = vadd.f32 %v2746_v16, %v2745_v62 }
 0x9c7   : > { %v2783_v24 = vrot.slane %v2782_v35, 2  ;;  %v2748_v15 = vrot.slane %v2747_v3, 1 }
 0x9c9   : > { %v2784_v22 = vadd.f32 %v2783_v24, %v2782_v35  ;;  %v2749_v13 = vadd.f32 %v2748_v15, %v2747_v3 }
 0x9cb   : > { %3461 = vpush %v2749_v13  ;;  %v2785_v25 = vrot.slane %v2784_v22, 1 }
 0x9cd   : > { %v2786_v60 = vadd.f32 %v2785_v25, %v2784_v22 }
 0x9cf   : > { %3463 = vpush %v2786_v60 }
 0x9fc   : > { %s3462_s14 = spop %3461 }
 0x9fd   : > { %v2754_v6 = vstv %s3462_s14 }
 0x9fe   : > { %v2755_v11 = vmul.f32 %v2754_v6, %v2751_v10  ;;  %v2756_v46 = vmul.f32 %v3100_v27, %v2754_v6 }
 0xa00   : > { %s3464_s23 = spop %3463  ;;  %v2757_v61 = vadd.f32 %v2755_v11, %v2719_v49  ;;  %v2758_v63 = vadd.f32 %v2756_v46, %v2720_v33 }
 0xa01   : > { %v2792_v56 = vstv %s3464_s23 }
 0xa02   : > { %v2793_v2 = vmul.f32 %v3106_v51, %v2792_v56  ;;  %v2794_v4 = vmul.f32 %v3107_v53, %v2792_v56 }
 0xa04   : > { %v2795_v7 = vadd.f32 %v2793_v2, %v2757_v61  ;;  %v2796_v9 = vadd.f32 %v2794_v4, %v2758_v63 }
 0xa06   : > { %v2797_v12 = vmax.f32 %v2795_v7, 0.0  ;;  %v2798_v14 = vmax.f32 %v2796_v9, 0.0 }
 0xa08   : > { %2799 = vst [vmem:[%s330_s27] sm:$0xff] %v2797_v12  ;;  %2804 = vst.msk [vmem:[%s330_s27 + $0x8] sm:$0x1f] %vm2802_vm7, %v2798_v14 }
 0xa09 PF: > { %s19_s30 = sadd.s32 1, %s3481_s30  }
 0xa0a   : > { %p16_p4 = scmp.ge.s32.totalorder %s19_s30, 4  }
 0xa0c   :  { %18 = sbr.rel (!%p16_p4) target bundleno = 1 (0x1), region = 106 }

</bundles_post_ra>
